<compile_context>
chip_gen: v6e
topology: v6e:2x2x1
jax: 0.10.0
libtpu: 0.0.40
codegen_flags: <defaults>
</compile_context>

<pallas_src>
import functools
import math

import jax
import jax.numpy as jnp
from jax import lax
from jax.experimental import pallas as pl
from jax.experimental.pallas import tpu as pltpu


# ---------------------------------------------------------------------------
# Fused multi-head attention kernel (one query tile per grid step)
# ---------------------------------------------------------------------------
def mha_kernel(q_ref, k_ref, v_ref, wq_ref, wk_ref, wv_ref, wo_ref, o_ref,
               kp_sc, vp_sc, s_sc, *, num_heads):
    B, tq, Dq = q_ref.shape
    _, Sk, Dk = k_ref.shape
    Dv = v_ref.shape[2]
    Dh = wq_ref.shape[1]                     # num_hiddens
    H = num_heads
    dh = Dh // H                             # per-head dim
    N = B * H
    scale = 1.0 / math.sqrt(dh)

    # --- K/V projections are query-tile invariant: project once on the first
    # grid step (axis is "arbitrary" => sequential) and cache in bf16 scratch.
    @pl.when(pl.program_id(0) == 0)
    def _():
        k2 = k_ref[...].reshape(B * Sk, Dk).astype(jnp.bfloat16)
        v2 = v_ref[...].reshape(B * Sk, Dv).astype(jnp.bfloat16)
        wk = wk_ref[...].astype(jnp.bfloat16)
        wv = wv_ref[...].astype(jnp.bfloat16)
        kp = jnp.dot(k2, wk, preferred_element_type=jnp.float32)   # (B*Sk, Dh)
        vp = jnp.dot(v2, wv, preferred_element_type=jnp.float32)   # (B*Sk, Dh)
        kp_sc[...] = kp.reshape(B, Sk, Dh).astype(jnp.bfloat16)
        vp_sc[...] = vp.reshape(B, Sk, Dh).astype(jnp.bfloat16)

    # --- Q projection: one batched MXU matmul per grid step (bf16 operands,
    # f32 accumulation) with the 1/sqrt(dh) scale folded in once.
    q2 = q_ref[...].reshape(B * tq, Dq).astype(jnp.bfloat16)
    wq = wq_ref[...].astype(jnp.bfloat16)
    qp = jnp.dot(q2, wq, preferred_element_type=jnp.float32) * scale
    qp = qp.astype(jnp.bfloat16)                                   # (B*tq, Dh)

    # --- per-(batch, head) scores -> VMEM scratch (one slab live at a time),
    # carrying the running max needed for the dim=0 softmax.
    m = None
    for b in range(B):
        for h in range(H):
            n = b * H + h
            qh = qp[b * tq:(b + 1) * tq, h * dh:(h + 1) * dh]      # (tq, dh)
            kh = kp_sc[b, :, h * dh:(h + 1) * dh]                  # (Sk, dh)
            s = lax.dot_general(qh, kh, (((1,), (1,)), ((), ())),
                                preferred_element_type=jnp.float32)
            s_sc[n] = s
            m = s if m is None else jnp.maximum(m, s)

    # --- softmax over dim=0 (batch*head axis), exactly as the reference:
    # exp/sum pass over the scratch via fori_loop (bounded vreg pressure).
    def exp_sum(n, den):
        e = jnp.exp(s_sc[n] - m)
        s_sc[n] = e
        return den + e

    den = lax.fori_loop(0, N, exp_sum, jnp.zeros((tq, Sk), jnp.float32),
                        unroll=True)
    inv = pl.reciprocal(den, approx=True)        # EUP slot, off the VALU path
    # TODO(synk): nn.Dropout on the attention weights is identity in eval mode.

    # --- attention * V and output projection: heads accumulate straight into a
    # lane-dense (tq, Dh) f32 accumulator via W_o row-slices (no lane concat).
    wo = wo_ref[...].astype(jnp.bfloat16)
    for b in range(B):
        acc = jnp.zeros((tq, Dh), jnp.float32)
        for h in range(H):
            n = b * H + h
            w = (s_sc[n] * inv).astype(jnp.bfloat16)               # (tq, Sk)
            vh = vp_sc[b, :, h * dh:(h + 1) * dh]                  # (Sk, dh)
            head = jnp.dot(w, vh, preferred_element_type=jnp.float32)
            acc = acc + jnp.dot(head.astype(jnp.bfloat16),
                                wo[h * dh:(h + 1) * dh, :],
                                preferred_element_type=jnp.float32)
        o_ref[b] = acc.astype(o_ref.dtype)


def multi_head_attention(queries, keys, values, params, *, num_heads, tq=None):
    B, Sq, Dq = queries.shape
    _, Sk, Dk = keys.shape
    _, _, Dv = values.shape
    Dh = params["WqT"].shape[1]
    H = num_heads
    assert Dh % H == 0
    assert Sk % 8 == 0, "key/value sequence length must be a multiple of 8"

    if tq is None:
        # biggest query tile (multiple of 8) that still gives >= 2 grid steps
        tq = Sq
        for cand in (512, 256, 128, 64, 32, 16, 8):
            if Sq % cand == 0 and Sq // cand >= 2:
                tq = cand
                break
    assert Sq % tq == 0 and tq % 8 == 0

    kern = functools.partial(mha_kernel, num_heads=H)

    return pl.pallas_call(
        kern,
        out_shape=jax.ShapeDtypeStruct((B, Sq, Dh), jnp.float32),
        grid=(Sq // tq,),
        in_specs=[
            pl.BlockSpec((B, tq, Dq), lambda i: (0, i, 0)),   # queries tile
            pl.BlockSpec((B, Sk, Dk), lambda i: (0, 0, 0)),   # full keys
            pl.BlockSpec((B, Sk, Dv), lambda i: (0, 0, 0)),   # full values
            pl.BlockSpec((Dq, Dh), lambda i: (0, 0)),         # W_q^T
            pl.BlockSpec((Dk, Dh), lambda i: (0, 0)),         # W_k^T
            pl.BlockSpec((Dv, Dh), lambda i: (0, 0)),         # W_v^T
            pl.BlockSpec((Dh, Dh), lambda i: (0, 0)),         # W_o^T
        ],
        out_specs=pl.BlockSpec((B, tq, Dh), lambda i: (0, i, 0)),
        scratch_shapes=[
            pltpu.VMEM((B, Sk, Dh), jnp.bfloat16),            # cached K proj
            pltpu.VMEM((B, Sk, Dh), jnp.bfloat16),            # cached V proj
            pltpu.VMEM((B * H, tq, Sk), jnp.float32),         # score/exp slabs
        ],
        compiler_params=pltpu.CompilerParams(
            # "arbitrary": sequential grid guarantees the pl.when(pid==0)
            # K/V-cache init runs before any reuse (megacore "parallel" would
            # need a per-core init flag instead).
            dimension_semantics=("arbitrary",),
            vmem_limit_bytes=64 * 1024 * 1024),
    )(queries, keys, values,
      params["WqT"], params["WkT"], params["WvT"], params["WoT"])


# ---------------------------------------------------------------------------
# Deterministic synthetic parameters (PyTorch Linear, bias=False)
# ---------------------------------------------------------------------------
def init_params(key, query_size, key_size, value_size, num_hiddens):
    ks = jax.random.split(key, 4)

    def lin(k, din, dout):
        # PyTorch Linear weight is (dout, din); store transposed (din, dout).
        w = jax.random.normal(k, (dout, din), dtype=jnp.float32) / math.sqrt(din)
        return w.T

    return dict(
        WqT=lin(ks[0], query_size, num_hiddens),
        WkT=lin(ks[1], key_size, num_hiddens),
        WvT=lin(ks[2], value_size, num_hiddens),
        WoT=lin(ks[3], num_hiddens, num_hiddens),
    )


# ---------------------------------------------------------------------------
# Pure-JAX reference mirroring the PyTorch module exactly (incl. softmax dim=0)
# ---------------------------------------------------------------------------
def forward_reference(queries, keys, values, params, *, num_heads):
    def transpose_qkv(X, H):
        B, S, Dh = X.shape
        X = X.reshape(B, S, H, Dh // H)
        X = jnp.transpose(X, (0, 2, 1, 3))
        return X.reshape(B * H, S, Dh // H)

    def transpose_output(X, H):
        BH, S, dh = X.shape
        X = X.reshape(-1, H, S, dh)
        X = jnp.transpose(X, (0, 2, 1, 3))
        return X.reshape(X.shape[0], S, -1)

    q = transpose_qkv(queries @ params["WqT"], num_heads)
    k = transpose_qkv(keys @ params["WkT"], num_heads)
    v = transpose_qkv(values @ params["WvT"], num_heads)

    d = q.shape[-1]
    scores = jnp.einsum('nqd,nkd->nqk', q, k) / math.sqrt(d)
    w = jax.nn.softmax(scores, axis=0)         # dim=0, as in the PyTorch spec
    out = jnp.einsum('nqk,nkd->nqd', w, v)     # dropout = identity (eval mode)
    out = transpose_output(out, num_heads)
    return out @ params["WoT"]


# ---------------------------------------------------------------------------
if __name__ == "__main__":
    B = 2
    Sq = Sk = 16
    query_size = key_size = value_size = 16
    num_hiddens = 32
    num_heads = 4
    # dropout = 0.0 (eval-mode inference -> identity on attention weights)

    key = jax.random.PRNGKey(0)
    kq, kk, kv, kp = jax.random.split(key, 4)
    queries = jax.random.normal(kq, (B, Sq, query_size), dtype=jnp.float32)
    keys_x = jax.random.normal(kk, (B, Sk, key_size), dtype=jnp.float32)
    values_x = jax.random.normal(kv, (B, Sk, value_size), dtype=jnp.float32)
    params = init_params(kp, query_size, key_size, value_size, num_hiddens)

    out = multi_head_attention(queries, keys_x, values_x, params,
                               num_heads=num_heads)
    out = jax.block_until_ready(out)

    ref = forward_reference(queries, keys_x, values_x, params,
                            num_heads=num_heads)
    # bf16 MXU operands (f32 accumulation) loosen the tolerance vs the f32 ref.
    err = float(jnp.max(jnp.abs(out - ref)))
    assert err < 1e-1, f"mismatch vs reference: {err}"
    print("KERNEL_OK")
</pallas_src>

<mosaic_0001>
module attributes {stable_mosaic.version = 11 : i64} {
  func.func @mha_kernel(%arg0: i32, %arg1: memref<2x8x16xf32, #tpu.memory_space<vmem>>, %arg2: memref<2x16x16xf32, #tpu.memory_space<vmem>>, %arg3: memref<2x16x16xf32, #tpu.memory_space<vmem>>, %arg4: memref<16x32xf32, #tpu.memory_space<vmem>>, %arg5: memref<16x32xf32, #tpu.memory_space<vmem>>, %arg6: memref<16x32xf32, #tpu.memory_space<vmem>>, %arg7: memref<32x32xf32, #tpu.memory_space<vmem>>, %arg8: memref<2x8x32xf32, #tpu.memory_space<vmem>>, %arg9: memref<2x16x32xbf16, #tpu.memory_space<vmem>>, %arg10: memref<2x16x32xbf16, #tpu.memory_space<vmem>>, %arg11: memref<8x8x16xf32, #tpu.memory_space<vmem>>) attributes {dimension_semantics = [#tpu.dimension_semantics<arbitrary>], iteration_bounds = array<i64: 2>, scalar_prefetch = 0 : i64, scratch_operands = 3 : i64, tpu.core_type = #tpu.core_type<tc>, window_params = [{transform_indices = @transform_0, window_bounds = array<i64: 2, 8, 16>}, {pipeline_mode = #tpu.pipeline_mode<synchronous>, transform_indices = @transform_1, window_bounds = array<i64: 2, 16, 16>}, {pipeline_mode = #tpu.pipeline_mode<synchronous>, transform_indices = @transform_2, window_bounds = array<i64: 2, 16, 16>}, {pipeline_mode = #tpu.pipeline_mode<synchronous>, transform_indices = @transform_3, window_bounds = array<i64: 16, 32>}, {pipeline_mode = #tpu.pipeline_mode<synchronous>, transform_indices = @transform_4, window_bounds = array<i64: 16, 32>}, {pipeline_mode = #tpu.pipeline_mode<synchronous>, transform_indices = @transform_5, window_bounds = array<i64: 16, 32>}, {pipeline_mode = #tpu.pipeline_mode<synchronous>, transform_indices = @transform_6, window_bounds = array<i64: 32, 32>}, {transform_indices = @transform_7, window_bounds = array<i64: 2, 8, 32>}]} {
    %c0_i32 = arith.constant 0 : i32
    %0 = arith.cmpi eq, %arg0, %c0_i32 : i32
    %1 = arith.extui %0 : i1 to i32
    %c0_i32_0 = arith.constant 0 : i32
    %2 = arith.cmpi ne, %1, %c0_i32_0 : i32
    scf.if %2 {
      %c0_160 = arith.constant 0 : index
      %c0_161 = arith.constant 0 : index
      %c0_162 = arith.constant 0 : index
      %255 = vector.load %arg2[%c0_160, %c0_161, %c0_162] : memref<2x16x16xf32, #tpu.memory_space<vmem>>, vector<2x16x16xf32>
      %256 = vector.shape_cast %255 : vector<2x16x16xf32> to vector<32x16xf32>
      %257 = arith.truncf %256 : vector<32x16xf32> to vector<32x16xbf16>
      %c0_163 = arith.constant 0 : index
      %c0_164 = arith.constant 0 : index
      %c0_165 = arith.constant 0 : index
      %258 = vector.load %arg3[%c0_163, %c0_164, %c0_165] : memref<2x16x16xf32, #tpu.memory_space<vmem>>, vector<2x16x16xf32>
      %259 = vector.shape_cast %258 : vector<2x16x16xf32> to vector<32x16xf32>
      %260 = arith.truncf %259 : vector<32x16xf32> to vector<32x16xbf16>
      %c0_166 = arith.constant 0 : index
      %c0_167 = arith.constant 0 : index
      %261 = vector.load %arg5[%c0_166, %c0_167] : memref<16x32xf32, #tpu.memory_space<vmem>>, vector<16x32xf32>
      %262 = arith.truncf %261 : vector<16x32xf32> to vector<16x32xbf16>
      %c0_168 = arith.constant 0 : index
      %c0_169 = arith.constant 0 : index
      %263 = vector.load %arg6[%c0_168, %c0_169] : memref<16x32xf32, #tpu.memory_space<vmem>>, vector<16x32xf32>
      %264 = arith.truncf %263 : vector<16x32xf32> to vector<16x32xbf16>
      %cst_170 = arith.constant dense<0.000000e+00> : vector<32x32xf32>
      %265 = tpu.matmul %257, %262, %cst_170 {dimension_numbers = #tpu.dot_dimension_numbers<[1], [0], [0], [1], [0, 0, 1, 1], [], []>} : vector<32x16xbf16>, vector<16x32xbf16>, vector<32x32xf32> -> vector<32x32xf32>
      %cst_171 = arith.constant dense<0.000000e+00> : vector<32x32xf32>
      %266 = tpu.matmul %260, %264, %cst_171 {dimension_numbers = #tpu.dot_dimension_numbers<[1], [0], [0], [1], [0, 0, 1, 1], [], []>} : vector<32x16xbf16>, vector<16x32xbf16>, vector<32x32xf32> -> vector<32x32xf32>
      %267 = vector.shape_cast %265 : vector<32x32xf32> to vector<2x16x32xf32>
      %268 = arith.truncf %267 : vector<2x16x32xf32> to vector<2x16x32xbf16>
      %c0_172 = arith.constant 0 : index
      %c0_173 = arith.constant 0 : index
      %c0_174 = arith.constant 0 : index
      %269 = vector.load %arg9[%c0_172, %c0_173, %c0_174] : memref<2x16x32xbf16, #tpu.memory_space<vmem>>, vector<2x16x32xbf16>
      tpu.vector_store %arg9[%c0_172, %c0_173, %c0_174], %268 {strides = array<i32>} : memref<2x16x32xbf16, #tpu.memory_space<vmem>>, vector<2x16x32xbf16>,
      %270 = vector.shape_cast %266 : vector<32x32xf32> to vector<2x16x32xf32>
      %271 = arith.truncf %270 : vector<2x16x32xf32> to vector<2x16x32xbf16>
      %c0_175 = arith.constant 0 : index
      %c0_176 = arith.constant 0 : index
      %c0_177 = arith.constant 0 : index
      %272 = vector.load %arg10[%c0_175, %c0_176, %c0_177] : memref<2x16x32xbf16, #tpu.memory_space<vmem>>, vector<2x16x32xbf16>
      tpu.vector_store %arg10[%c0_175, %c0_176, %c0_177], %271 {strides = array<i32>} : memref<2x16x32xbf16, #tpu.memory_space<vmem>>, vector<2x16x32xbf16>,
    } else {
    }
    %c0 = arith.constant 0 : index
    %c0_1 = arith.constant 0 : index
    %c0_2 = arith.constant 0 : index
    %3 = vector.load %arg1[%c0, %c0_1, %c0_2] : memref<2x8x16xf32, #tpu.memory_space<vmem>>, vector<2x8x16xf32>
    %4 = vector.shape_cast %3 : vector<2x8x16xf32> to vector<16x16xf32>
    %5 = arith.truncf %4 : vector<16x16xf32> to vector<16x16xbf16>
    %c0_3 = arith.constant 0 : index
    %c0_4 = arith.constant 0 : index
    %6 = vector.load %arg4[%c0_3, %c0_4] : memref<16x32xf32, #tpu.memory_space<vmem>>, vector<16x32xf32>
    %7 = arith.truncf %6 : vector<16x32xf32> to vector<16x32xbf16>
    %cst = arith.constant dense<0.000000e+00> : vector<16x32xf32>
    %8 = tpu.matmul %5, %7, %cst {dimension_numbers = #tpu.dot_dimension_numbers<[1], [0], [0], [1], [0, 0, 1, 1], [], []>} : vector<16x16xbf16>, vector<16x32xbf16>, vector<16x32xf32> -> vector<16x32xf32>
    %cst_5 = arith.constant 0.353553385 : f32
    %9 = vector.broadcast %cst_5 : f32 to vector<16x32xf32>
    %10 = arith.mulf %8, %9 : vector<16x32xf32>
    %11 = arith.truncf %10 : vector<16x32xf32> to vector<16x32xbf16>
    %12 = vector.extract_strided_slice %11 {offsets = [0, 0], sizes = [8, 8], strides = [1, 1]} : vector<16x32xbf16> to vector<8x8xbf16>
    %c0_6 = arith.constant 0 : index
    %c0_7 = arith.constant 0 : index
    %c0_8 = arith.constant 0 : index
    %13 = vector.load %arg9[%c0_6, %c0_7, %c0_8] : memref<2x16x32xbf16, #tpu.memory_space<vmem>>, vector<1x16x8xbf16>
    %14 = vector.shape_cast %13 : vector<1x16x8xbf16> to vector<16x8xbf16>
    %cst_9 = arith.constant dense<0.000000e+00> : vector<8x16xf32>
    %15 = tpu.matmul %12, %14, %cst_9 {dimension_numbers = #tpu.dot_dimension_numbers<[1], [1], [0], [0], [0, 0, 1, 0], [], []>} : vector<8x8xbf16>, vector<16x8xbf16>, vector<8x16xf32> -> vector<8x16xf32>
    %c0_10 = arith.constant 0 : index
    %c0_11 = arith.constant 0 : index
    %c0_12 = arith.constant 0 : index
    %16 = vector.load %arg11[%c0_10, %c0_11, %c0_12] : memref<8x8x16xf32, #tpu.memory_space<vmem>>, vector<1x8x16xf32>
    %17 = vector.shape_cast %16 : vector<1x8x16xf32> to vector<8x16xf32>
    %18 = vector.shape_cast %15 : vector<8x16xf32> to vector<1x8x16xf32>
    tpu.vector_store %arg11[%c0_10, %c0_11, %c0_12], %18 {strides = array<i32>} : memref<8x8x16xf32, #tpu.memory_space<vmem>>, vector<1x8x16xf32>,
    %19 = vector.extract_strided_slice %11 {offsets = [0, 8], sizes = [8, 8], strides = [1, 1]} : vector<16x32xbf16> to vector<8x8xbf16>
    %c0_13 = arith.constant 0 : index
    %c0_14 = arith.constant 0 : index
    %c8 = arith.constant 8 : index
    %20 = vector.load %arg9[%c0_13, %c0_14, %c8] : memref<2x16x32xbf16, #tpu.memory_space<vmem>>, vector<1x16x8xbf16>
    %21 = vector.shape_cast %20 : vector<1x16x8xbf16> to vector<16x8xbf16>
    %cst_15 = arith.constant dense<0.000000e+00> : vector<8x16xf32>
    %22 = tpu.matmul %19, %21, %cst_15 {dimension_numbers = #tpu.dot_dimension_numbers<[1], [1], [0], [0], [0, 0, 1, 0], [], []>} : vector<8x8xbf16>, vector<16x8xbf16>, vector<8x16xf32> -> vector<8x16xf32>
    %c1 = arith.constant 1 : index
    %c0_16 = arith.constant 0 : index
    %c0_17 = arith.constant 0 : index
    %23 = vector.load %arg11[%c1, %c0_16, %c0_17] : memref<8x8x16xf32, #tpu.memory_space<vmem>>, vector<1x8x16xf32>
    %24 = vector.shape_cast %23 : vector<1x8x16xf32> to vector<8x16xf32>
    %25 = vector.shape_cast %22 : vector<8x16xf32> to vector<1x8x16xf32>
    tpu.vector_store %arg11[%c1, %c0_16, %c0_17], %25 {strides = array<i32>} : memref<8x8x16xf32, #tpu.memory_space<vmem>>, vector<1x8x16xf32>,
    %26 = arith.maximumf %15, %22 : vector<8x16xf32>
    %27 = vector.extract_strided_slice %11 {offsets = [0, 16], sizes = [8, 8], strides = [1, 1]} : vector<16x32xbf16> to vector<8x8xbf16>
    %c0_18 = arith.constant 0 : index
    %c0_19 = arith.constant 0 : index
    %c16 = arith.constant 16 : index
    %28 = vector.load %arg9[%c0_18, %c0_19, %c16] : memref<2x16x32xbf16, #tpu.memory_space<vmem>>, vector<1x16x8xbf16>
    %29 = vector.shape_cast %28 : vector<1x16x8xbf16> to vector<16x8xbf16>
    %cst_20 = arith.constant dense<0.000000e+00> : vector<8x16xf32>
    %30 = tpu.matmul %27, %29, %cst_20 {dimension_numbers = #tpu.dot_dimension_numbers<[1], [1], [0], [0], [0, 0, 1, 0], [], []>} : vector<8x8xbf16>, vector<16x8xbf16>, vector<8x16xf32> -> vector<8x16xf32>
    %c2 = arith.constant 2 : index
    %c0_21 = arith.constant 0 : index
    %c0_22 = arith.constant 0 : index
    %31 = vector.load %arg11[%c2, %c0_21, %c0_22] : memref<8x8x16xf32, #tpu.memory_space<vmem>>, vector<1x8x16xf32>
    %32 = vector.shape_cast %31 : vector<1x8x16xf32> to vector<8x16xf32>
    %33 = vector.shape_cast %30 : vector<8x16xf32> to vector<1x8x16xf32>
    tpu.vector_store %arg11[%c2, %c0_21, %c0_22], %33 {strides = array<i32>} : memref<8x8x16xf32, #tpu.memory_space<vmem>>, vector<1x8x16xf32>,
    %34 = arith.maximumf %26, %30 : vector<8x16xf32>
    %35 = vector.extract_strided_slice %11 {offsets = [0, 24], sizes = [8, 8], strides = [1, 1]} : vector<16x32xbf16> to vector<8x8xbf16>
    %c0_23 = arith.constant 0 : index
    %c0_24 = arith.constant 0 : index
    %c24 = arith.constant 24 : index
    %36 = vector.load %arg9[%c0_23, %c0_24, %c24] : memref<2x16x32xbf16, #tpu.memory_space<vmem>>, vector<1x16x8xbf16>
    %37 = vector.shape_cast %36 : vector<1x16x8xbf16> to vector<16x8xbf16>
    %cst_25 = arith.constant dense<0.000000e+00> : vector<8x16xf32>
    %38 = tpu.matmul %35, %37, %cst_25 {dimension_numbers = #tpu.dot_dimension_numbers<[1], [1], [0], [0], [0, 0, 1, 0], [], []>} : vector<8x8xbf16>, vector<16x8xbf16>, vector<8x16xf32> -> vector<8x16xf32>
    %c3 = arith.constant 3 : index
    %c0_26 = arith.constant 0 : index
    %c0_27 = arith.constant 0 : index
    %39 = vector.load %arg11[%c3, %c0_26, %c0_27] : memref<8x8x16xf32, #tpu.memory_space<vmem>>, vector<1x8x16xf32>
    %40 = vector.shape_cast %39 : vector<1x8x16xf32> to vector<8x16xf32>
    %41 = vector.shape_cast %38 : vector<8x16xf32> to vector<1x8x16xf32>
    tpu.vector_store %arg11[%c3, %c0_26, %c0_27], %41 {strides = array<i32>} : memref<8x8x16xf32, #tpu.memory_space<vmem>>, vector<1x8x16xf32>,
    %42 = arith.maximumf %34, %38 : vector<8x16xf32>
    %43 = vector.extract_strided_slice %11 {offsets = [8, 0], sizes = [8, 8], strides = [1, 1]} : vector<16x32xbf16> to vector<8x8xbf16>
    %c1_28 = arith.constant 1 : index
    %c0_29 = arith.constant 0 : index
    %c0_30 = arith.constant 0 : index
    %44 = vector.load %arg9[%c1_28, %c0_29, %c0_30] : memref<2x16x32xbf16, #tpu.memory_space<vmem>>, vector<1x16x8xbf16>
    %45 = vector.shape_cast %44 : vector<1x16x8xbf16> to vector<16x8xbf16>
    %cst_31 = arith.constant dense<0.000000e+00> : vector<8x16xf32>
    %46 = tpu.matmul %43, %45, %cst_31 {dimension_numbers = #tpu.dot_dimension_numbers<[1], [1], [0], [0], [0, 0, 1, 0], [], []>} : vector<8x8xbf16>, vector<16x8xbf16>, vector<8x16xf32> -> vector<8x16xf32>
    %c4 = arith.constant 4 : index
    %c0_32 = arith.constant 0 : index
    %c0_33 = arith.constant 0 : index
    %47 = vector.load %arg11[%c4, %c0_32, %c0_33] : memref<8x8x16xf32, #tpu.memory_space<vmem>>, vector<1x8x16xf32>
    %48 = vector.shape_cast %47 : vector<1x8x16xf32> to vector<8x16xf32>
    %49 = vector.shape_cast %46 : vector<8x16xf32> to vector<1x8x16xf32>
    tpu.vector_store %arg11[%c4, %c0_32, %c0_33], %49 {strides = array<i32>} : memref<8x8x16xf32, #tpu.memory_space<vmem>>, vector<1x8x16xf32>,
    %50 = arith.maximumf %42, %46 : vector<8x16xf32>
    %51 = vector.extract_strided_slice %11 {offsets = [8, 8], sizes = [8, 8], strides = [1, 1]} : vector<16x32xbf16> to vector<8x8xbf16>
    %c1_34 = arith.constant 1 : index
    %c0_35 = arith.constant 0 : index
    %c8_36 = arith.constant 8 : index
    %52 = vector.load %arg9[%c1_34, %c0_35, %c8_36] : memref<2x16x32xbf16, #tpu.memory_space<vmem>>, vector<1x16x8xbf16>
    %53 = vector.shape_cast %52 : vector<1x16x8xbf16> to vector<16x8xbf16>
    %cst_37 = arith.constant dense<0.000000e+00> : vector<8x16xf32>
    %54 = tpu.matmul %51, %53, %cst_37 {dimension_numbers = #tpu.dot_dimension_numbers<[1], [1], [0], [0], [0, 0, 1, 0], [], []>} : vector<8x8xbf16>, vector<16x8xbf16>, vector<8x16xf32> -> vector<8x16xf32>
    %c5 = arith.constant 5 : index
    %c0_38 = arith.constant 0 : index
    %c0_39 = arith.constant 0 : index
    %55 = vector.load %arg11[%c5, %c0_38, %c0_39] : memref<8x8x16xf32, #tpu.memory_space<vmem>>, vector<1x8x16xf32>
    %56 = vector.shape_cast %55 : vector<1x8x16xf32> to vector<8x16xf32>
    %57 = vector.shape_cast %54 : vector<8x16xf32> to vector<1x8x16xf32>
    tpu.vector_store %arg11[%c5, %c0_38, %c0_39], %57 {strides = array<i32>} : memref<8x8x16xf32, #tpu.memory_space<vmem>>, vector<1x8x16xf32>,
    %58 = arith.maximumf %50, %54 : vector<8x16xf32>
    %59 = vector.extract_strided_slice %11 {offsets = [8, 16], sizes = [8, 8], strides = [1, 1]} : vector<16x32xbf16> to vector<8x8xbf16>
    %c1_40 = arith.constant 1 : index
    %c0_41 = arith.constant 0 : index
    %c16_42 = arith.constant 16 : index
    %60 = vector.load %arg9[%c1_40, %c0_41, %c16_42] : memref<2x16x32xbf16, #tpu.memory_space<vmem>>, vector<1x16x8xbf16>
    %61 = vector.shape_cast %60 : vector<1x16x8xbf16> to vector<16x8xbf16>
    %cst_43 = arith.constant dense<0.000000e+00> : vector<8x16xf32>
    %62 = tpu.matmul %59, %61, %cst_43 {dimension_numbers = #tpu.dot_dimension_numbers<[1], [1], [0], [0], [0, 0, 1, 0], [], []>} : vector<8x8xbf16>, vector<16x8xbf16>, vector<8x16xf32> -> vector<8x16xf32>
    %c6 = arith.constant 6 : index
    %c0_44 = arith.constant 0 : index
    %c0_45 = arith.constant 0 : index
    %63 = vector.load %arg11[%c6, %c0_44, %c0_45] : memref<8x8x16xf32, #tpu.memory_space<vmem>>, vector<1x8x16xf32>
    %64 = vector.shape_cast %63 : vector<1x8x16xf32> to vector<8x16xf32>
    %65 = vector.shape_cast %62 : vector<8x16xf32> to vector<1x8x16xf32>
    tpu.vector_store %arg11[%c6, %c0_44, %c0_45], %65 {strides = array<i32>} : memref<8x8x16xf32, #tpu.memory_space<vmem>>, vector<1x8x16xf32>,
    %66 = arith.maximumf %58, %62 : vector<8x16xf32>
    %67 = vector.extract_strided_slice %11 {offsets = [8, 24], sizes = [8, 8], strides = [1, 1]} : vector<16x32xbf16> to vector<8x8xbf16>
    %c1_46 = arith.constant 1 : index
    %c0_47 = arith.constant 0 : index
    %c24_48 = arith.constant 24 : index
    %68 = vector.load %arg9[%c1_46, %c0_47, %c24_48] : memref<2x16x32xbf16, #tpu.memory_space<vmem>>, vector<1x16x8xbf16>
    %69 = vector.shape_cast %68 : vector<1x16x8xbf16> to vector<16x8xbf16>
    %cst_49 = arith.constant dense<0.000000e+00> : vector<8x16xf32>
    %70 = tpu.matmul %67, %69, %cst_49 {dimension_numbers = #tpu.dot_dimension_numbers<[1], [1], [0], [0], [0, 0, 1, 0], [], []>} : vector<8x8xbf16>, vector<16x8xbf16>, vector<8x16xf32> -> vector<8x16xf32>
    %c7 = arith.constant 7 : index
    %c0_50 = arith.constant 0 : index
    %c0_51 = arith.constant 0 : index
    %71 = vector.load %arg11[%c7, %c0_50, %c0_51] : memref<8x8x16xf32, #tpu.memory_space<vmem>>, vector<1x8x16xf32>
    %72 = vector.shape_cast %71 : vector<1x8x16xf32> to vector<8x16xf32>
    %73 = vector.shape_cast %70 : vector<8x16xf32> to vector<1x8x16xf32>
    tpu.vector_store %arg11[%c7, %c0_50, %c0_51], %73 {strides = array<i32>} : memref<8x8x16xf32, #tpu.memory_space<vmem>>, vector<1x8x16xf32>,
    %74 = arith.maximumf %66, %70 : vector<8x16xf32>
    %cst_52 = arith.constant 0.000000e+00 : f32
    %75 = vector.broadcast %cst_52 : f32 to vector<8x16xf32>
    %c0_i32_53 = arith.constant 0 : i32
    %76 = arith.index_cast %c0_i32_53 : i32 to index
    %c0_54 = arith.constant 0 : index
    %c0_55 = arith.constant 0 : index
    %77 = vector.load %arg11[%76, %c0_54, %c0_55] : memref<8x8x16xf32, #tpu.memory_space<vmem>>, vector<1x8x16xf32>
    %78 = vector.shape_cast %77 : vector<1x8x16xf32> to vector<8x16xf32>
    %79 = arith.subf %78, %74 : vector<8x16xf32>
    %80 = math.exp %79 : vector<8x16xf32>
    %81 = arith.index_cast %c0_i32_53 : i32 to index
    %c0_56 = arith.constant 0 : index
    %c0_57 = arith.constant 0 : index
    %82 = vector.load %arg11[%81, %c0_56, %c0_57] : memref<8x8x16xf32, #tpu.memory_space<vmem>>, vector<1x8x16xf32>
    %83 = vector.shape_cast %82 : vector<1x8x16xf32> to vector<8x16xf32>
    %84 = vector.shape_cast %80 : vector<8x16xf32> to vector<1x8x16xf32>
    tpu.vector_store %arg11[%81, %c0_56, %c0_57], %84 {strides = array<i32>} : memref<8x8x16xf32, #tpu.memory_space<vmem>>, vector<1x8x16xf32>,
    %85 = arith.addf %75, %80 : vector<8x16xf32>
    %c1_i32 = arith.constant 1 : i32
    %86 = arith.index_cast %c1_i32 : i32 to index
    %c0_58 = arith.constant 0 : index
    %c0_59 = arith.constant 0 : index
    %87 = vector.load %arg11[%86, %c0_58, %c0_59] : memref<8x8x16xf32, #tpu.memory_space<vmem>>, vector<1x8x16xf32>
    %88 = vector.shape_cast %87 : vector<1x8x16xf32> to vector<8x16xf32>
    %89 = arith.subf %88, %74 : vector<8x16xf32>
    %90 = math.exp %89 : vector<8x16xf32>
    %91 = arith.index_cast %c1_i32 : i32 to index
    %c0_60 = arith.constant 0 : index
    %c0_61 = arith.constant 0 : index
    %92 = vector.load %arg11[%91, %c0_60, %c0_61] : memref<8x8x16xf32, #tpu.memory_space<vmem>>, vector<1x8x16xf32>
    %93 = vector.shape_cast %92 : vector<1x8x16xf32> to vector<8x16xf32>
    %94 = vector.shape_cast %90 : vector<8x16xf32> to vector<1x8x16xf32>
    tpu.vector_store %arg11[%91, %c0_60, %c0_61], %94 {strides = array<i32>} : memref<8x8x16xf32, #tpu.memory_space<vmem>>, vector<1x8x16xf32>,
    %95 = arith.addf %85, %90 : vector<8x16xf32>
    %c2_i32 = arith.constant 2 : i32
    %96 = arith.index_cast %c2_i32 : i32 to index
    %c0_62 = arith.constant 0 : index
    %c0_63 = arith.constant 0 : index
    %97 = vector.load %arg11[%96, %c0_62, %c0_63] : memref<8x8x16xf32, #tpu.memory_space<vmem>>, vector<1x8x16xf32>
    %98 = vector.shape_cast %97 : vector<1x8x16xf32> to vector<8x16xf32>
    %99 = arith.subf %98, %74 : vector<8x16xf32>
    %100 = math.exp %99 : vector<8x16xf32>
    %101 = arith.index_cast %c2_i32 : i32 to index
    %c0_64 = arith.constant 0 : index
    %c0_65 = arith.constant 0 : index
    %102 = vector.load %arg11[%101, %c0_64, %c0_65] : memref<8x8x16xf32, #tpu.memory_space<vmem>>, vector<1x8x16xf32>
    %103 = vector.shape_cast %102 : vector<1x8x16xf32> to vector<8x16xf32>
    %104 = vector.shape_cast %100 : vector<8x16xf32> to vector<1x8x16xf32>
    tpu.vector_store %arg11[%101, %c0_64, %c0_65], %104 {strides = array<i32>} : memref<8x8x16xf32, #tpu.memory_space<vmem>>, vector<1x8x16xf32>,
    %105 = arith.addf %95, %100 : vector<8x16xf32>
    %c3_i32 = arith.constant 3 : i32
    %106 = arith.index_cast %c3_i32 : i32 to index
    %c0_66 = arith.constant 0 : index
    %c0_67 = arith.constant 0 : index
    %107 = vector.load %arg11[%106, %c0_66, %c0_67] : memref<8x8x16xf32, #tpu.memory_space<vmem>>, vector<1x8x16xf32>
    %108 = vector.shape_cast %107 : vector<1x8x16xf32> to vector<8x16xf32>
    %109 = arith.subf %108, %74 : vector<8x16xf32>
    %110 = math.exp %109 : vector<8x16xf32>
    %111 = arith.index_cast %c3_i32 : i32 to index
    %c0_68 = arith.constant 0 : index
    %c0_69 = arith.constant 0 : index
    %112 = vector.load %arg11[%111, %c0_68, %c0_69] : memref<8x8x16xf32, #tpu.memory_space<vmem>>, vector<1x8x16xf32>
    %113 = vector.shape_cast %112 : vector<1x8x16xf32> to vector<8x16xf32>
    %114 = vector.shape_cast %110 : vector<8x16xf32> to vector<1x8x16xf32>
    tpu.vector_store %arg11[%111, %c0_68, %c0_69], %114 {strides = array<i32>} : memref<8x8x16xf32, #tpu.memory_space<vmem>>, vector<1x8x16xf32>,
    %115 = arith.addf %105, %110 : vector<8x16xf32>
    %c4_i32 = arith.constant 4 : i32
    %116 = arith.index_cast %c4_i32 : i32 to index
    %c0_70 = arith.constant 0 : index
    %c0_71 = arith.constant 0 : index
    %117 = vector.load %arg11[%116, %c0_70, %c0_71] : memref<8x8x16xf32, #tpu.memory_space<vmem>>, vector<1x8x16xf32>
    %118 = vector.shape_cast %117 : vector<1x8x16xf32> to vector<8x16xf32>
    %119 = arith.subf %118, %74 : vector<8x16xf32>
    %120 = math.exp %119 : vector<8x16xf32>
    %121 = arith.index_cast %c4_i32 : i32 to index
    %c0_72 = arith.constant 0 : index
    %c0_73 = arith.constant 0 : index
    %122 = vector.load %arg11[%121, %c0_72, %c0_73] : memref<8x8x16xf32, #tpu.memory_space<vmem>>, vector<1x8x16xf32>
    %123 = vector.shape_cast %122 : vector<1x8x16xf32> to vector<8x16xf32>
    %124 = vector.shape_cast %120 : vector<8x16xf32> to vector<1x8x16xf32>
    tpu.vector_store %arg11[%121, %c0_72, %c0_73], %124 {strides = array<i32>} : memref<8x8x16xf32, #tpu.memory_space<vmem>>, vector<1x8x16xf32>,
    %125 = arith.addf %115, %120 : vector<8x16xf32>
    %c5_i32 = arith.constant 5 : i32
    %126 = arith.index_cast %c5_i32 : i32 to index
    %c0_74 = arith.constant 0 : index
    %c0_75 = arith.constant 0 : index
    %127 = vector.load %arg11[%126, %c0_74, %c0_75] : memref<8x8x16xf32, #tpu.memory_space<vmem>>, vector<1x8x16xf32>
    %128 = vector.shape_cast %127 : vector<1x8x16xf32> to vector<8x16xf32>
    %129 = arith.subf %128, %74 : vector<8x16xf32>
    %130 = math.exp %129 : vector<8x16xf32>
    %131 = arith.index_cast %c5_i32 : i32 to index
    %c0_76 = arith.constant 0 : index
    %c0_77 = arith.constant 0 : index
    %132 = vector.load %arg11[%131, %c0_76, %c0_77] : memref<8x8x16xf32, #tpu.memory_space<vmem>>, vector<1x8x16xf32>
    %133 = vector.shape_cast %132 : vector<1x8x16xf32> to vector<8x16xf32>
    %134 = vector.shape_cast %130 : vector<8x16xf32> to vector<1x8x16xf32>
    tpu.vector_store %arg11[%131, %c0_76, %c0_77], %134 {strides = array<i32>} : memref<8x8x16xf32, #tpu.memory_space<vmem>>, vector<1x8x16xf32>,
    %135 = arith.addf %125, %130 : vector<8x16xf32>
    %c6_i32 = arith.constant 6 : i32
    %136 = arith.index_cast %c6_i32 : i32 to index
    %c0_78 = arith.constant 0 : index
    %c0_79 = arith.constant 0 : index
    %137 = vector.load %arg11[%136, %c0_78, %c0_79] : memref<8x8x16xf32, #tpu.memory_space<vmem>>, vector<1x8x16xf32>
    %138 = vector.shape_cast %137 : vector<1x8x16xf32> to vector<8x16xf32>
    %139 = arith.subf %138, %74 : vector<8x16xf32>
    %140 = math.exp %139 : vector<8x16xf32>
    %141 = arith.index_cast %c6_i32 : i32 to index
    %c0_80 = arith.constant 0 : index
    %c0_81 = arith.constant 0 : index
    %142 = vector.load %arg11[%141, %c0_80, %c0_81] : memref<8x8x16xf32, #tpu.memory_space<vmem>>, vector<1x8x16xf32>
    %143 = vector.shape_cast %142 : vector<1x8x16xf32> to vector<8x16xf32>
    %144 = vector.shape_cast %140 : vector<8x16xf32> to vector<1x8x16xf32>
    tpu.vector_store %arg11[%141, %c0_80, %c0_81], %144 {strides = array<i32>} : memref<8x8x16xf32, #tpu.memory_space<vmem>>, vector<1x8x16xf32>,
    %145 = arith.addf %135, %140 : vector<8x16xf32>
    %c7_i32 = arith.constant 7 : i32
    %146 = arith.index_cast %c7_i32 : i32 to index
    %c0_82 = arith.constant 0 : index
    %c0_83 = arith.constant 0 : index
    %147 = vector.load %arg11[%146, %c0_82, %c0_83] : memref<8x8x16xf32, #tpu.memory_space<vmem>>, vector<1x8x16xf32>
    %148 = vector.shape_cast %147 : vector<1x8x16xf32> to vector<8x16xf32>
    %149 = arith.subf %148, %74 : vector<8x16xf32>
    %150 = math.exp %149 : vector<8x16xf32>
    %151 = arith.index_cast %c7_i32 : i32 to index
    %c0_84 = arith.constant 0 : index
    %c0_85 = arith.constant 0 : index
    %152 = vector.load %arg11[%151, %c0_84, %c0_85] : memref<8x8x16xf32, #tpu.memory_space<vmem>>, vector<1x8x16xf32>
    %153 = vector.shape_cast %152 : vector<1x8x16xf32> to vector<8x16xf32>
    %154 = vector.shape_cast %150 : vector<8x16xf32> to vector<1x8x16xf32>
    tpu.vector_store %arg11[%151, %c0_84, %c0_85], %154 {strides = array<i32>} : memref<8x8x16xf32, #tpu.memory_space<vmem>>, vector<1x8x16xf32>,
    %155 = arith.addf %145, %150 : vector<8x16xf32>
    %c8_i32 = arith.constant 8 : i32
    %156 = tpu.reciprocal %155 {approx = true} : vector<8x16xf32> -> vector<8x16xf32>
    %c0_86 = arith.constant 0 : index
    %c0_87 = arith.constant 0 : index
    %157 = vector.load %arg7[%c0_86, %c0_87] : memref<32x32xf32, #tpu.memory_space<vmem>>, vector<32x32xf32>
    %158 = arith.truncf %157 : vector<32x32xf32> to vector<32x32xbf16>
    %cst_88 = arith.constant 0.000000e+00 : f32
    %159 = vector.broadcast %cst_88 : f32 to vector<8x32xf32>
    %c0_89 = arith.constant 0 : index
    %c0_90 = arith.constant 0 : index
    %c0_91 = arith.constant 0 : index
    %160 = vector.load %arg11[%c0_89, %c0_90, %c0_91] : memref<8x8x16xf32, #tpu.memory_space<vmem>>, vector<1x8x16xf32>
    %161 = vector.shape_cast %160 : vector<1x8x16xf32> to vector<8x16xf32>
    %162 = arith.mulf %161, %156 : vector<8x16xf32>
    %163 = arith.truncf %162 : vector<8x16xf32> to vector<8x16xbf16>
    %c0_92 = arith.constant 0 : index
    %c0_93 = arith.constant 0 : index
    %c0_94 = arith.constant 0 : index
    %164 = vector.load %arg10[%c0_92, %c0_93, %c0_94] : memref<2x16x32xbf16, #tpu.memory_space<vmem>>, vector<1x16x8xbf16>
    %165 = vector.shape_cast %164 : vector<1x16x8xbf16> to vector<16x8xbf16>
    %cst_95 = arith.constant dense<0.000000e+00> : vector<8x8xf32>
    %166 = tpu.matmul %163, %165, %cst_95 {dimension_numbers = #tpu.dot_dimension_numbers<[1], [0], [0], [1], [0, 0, 1, 1], [], []>} : vector<8x16xbf16>, vector<16x8xbf16>, vector<8x8xf32> -> vector<8x8xf32>
    %167 = arith.truncf %166 : vector<8x8xf32> to vector<8x8xbf16>
    %168 = vector.extract_strided_slice %158 {offsets = [0, 0], sizes = [8, 32], strides = [1, 1]} : vector<32x32xbf16> to vector<8x32xbf16>
    %cst_96 = arith.constant dense<0.000000e+00> : vector<8x32xf32>
    %169 = tpu.matmul %167, %168, %cst_96 {dimension_numbers = #tpu.dot_dimension_numbers<[1], [0], [0], [1], [0, 0, 1, 1], [], []>} : vector<8x8xbf16>, vector<8x32xbf16>, vector<8x32xf32> -> vector<8x32xf32>
    %170 = arith.addf %159, %169 : vector<8x32xf32>
    %c1_97 = arith.constant 1 : index
    %c0_98 = arith.constant 0 : index
    %c0_99 = arith.constant 0 : index
    %171 = vector.load %arg11[%c1_97, %c0_98, %c0_99] : memref<8x8x16xf32, #tpu.memory_space<vmem>>, vector<1x8x16xf32>
    %172 = vector.shape_cast %171 : vector<1x8x16xf32> to vector<8x16xf32>
    %173 = arith.mulf %172, %156 : vector<8x16xf32>
    %174 = arith.truncf %173 : vector<8x16xf32> to vector<8x16xbf16>
    %c0_100 = arith.constant 0 : index
    %c0_101 = arith.constant 0 : index
    %c8_102 = arith.constant 8 : index
    %175 = vector.load %arg10[%c0_100, %c0_101, %c8_102] : memref<2x16x32xbf16, #tpu.memory_space<vmem>>, vector<1x16x8xbf16>
    %176 = vector.shape_cast %175 : vector<1x16x8xbf16> to vector<16x8xbf16>
    %cst_103 = arith.constant dense<0.000000e+00> : vector<8x8xf32>
    %177 = tpu.matmul %174, %176, %cst_103 {dimension_numbers = #tpu.dot_dimension_numbers<[1], [0], [0], [1], [0, 0, 1, 1], [], []>} : vector<8x16xbf16>, vector<16x8xbf16>, vector<8x8xf32> -> vector<8x8xf32>
    %178 = arith.truncf %177 : vector<8x8xf32> to vector<8x8xbf16>
    %179 = vector.extract_strided_slice %158 {offsets = [8, 0], sizes = [8, 32], strides = [1, 1]} : vector<32x32xbf16> to vector<8x32xbf16>
    %cst_104 = arith.constant dense<0.000000e+00> : vector<8x32xf32>
    %180 = tpu.matmul %178, %179, %cst_104 {dimension_numbers = #tpu.dot_dimension_numbers<[1], [0], [0], [1], [0, 0, 1, 1], [], []>} : vector<8x8xbf16>, vector<8x32xbf16>, vector<8x32xf32> -> vector<8x32xf32>
    %181 = arith.addf %170, %180 : vector<8x32xf32>
    %c2_105 = arith.constant 2 : index
    %c0_106 = arith.constant 0 : index
    %c0_107 = arith.constant 0 : index
    %182 = vector.load %arg11[%c2_105, %c0_106, %c0_107] : memref<8x8x16xf32, #tpu.memory_space<vmem>>, vector<1x8x16xf32>
    %183 = vector.shape_cast %182 : vector<1x8x16xf32> to vector<8x16xf32>
    %184 = arith.mulf %183, %156 : vector<8x16xf32>
    %185 = arith.truncf %184 : vector<8x16xf32> to vector<8x16xbf16>
    %c0_108 = arith.constant 0 : index
    %c0_109 = arith.constant 0 : index
    %c16_110 = arith.constant 16 : index
    %186 = vector.load %arg10[%c0_108, %c0_109, %c16_110] : memref<2x16x32xbf16, #tpu.memory_space<vmem>>, vector<1x16x8xbf16>
    %187 = vector.shape_cast %186 : vector<1x16x8xbf16> to vector<16x8xbf16>
    %cst_111 = arith.constant dense<0.000000e+00> : vector<8x8xf32>
    %188 = tpu.matmul %185, %187, %cst_111 {dimension_numbers = #tpu.dot_dimension_numbers<[1], [0], [0], [1], [0, 0, 1, 1], [], []>} : vector<8x16xbf16>, vector<16x8xbf16>, vector<8x8xf32> -> vector<8x8xf32>
    %189 = arith.truncf %188 : vector<8x8xf32> to vector<8x8xbf16>
    %190 = vector.extract_strided_slice %158 {offsets = [16, 0], sizes = [8, 32], strides = [1, 1]} : vector<32x32xbf16> to vector<8x32xbf16>
    %cst_112 = arith.constant dense<0.000000e+00> : vector<8x32xf32>
    %191 = tpu.matmul %189, %190, %cst_112 {dimension_numbers = #tpu.dot_dimension_numbers<[1], [0], [0], [1], [0, 0, 1, 1], [], []>} : vector<8x8xbf16>, vector<8x32xbf16>, vector<8x32xf32> -> vector<8x32xf32>
    %192 = arith.addf %181, %191 : vector<8x32xf32>
    %c3_113 = arith.constant 3 : index
    %c0_114 = arith.constant 0 : index
    %c0_115 = arith.constant 0 : index
    %193 = vector.load %arg11[%c3_113, %c0_114, %c0_115] : memref<8x8x16xf32, #tpu.memory_space<vmem>>, vector<1x8x16xf32>
    %194 = vector.shape_cast %193 : vector<1x8x16xf32> to vector<8x16xf32>
    %195 = arith.mulf %194, %156 : vector<8x16xf32>
    %196 = arith.truncf %195 : vector<8x16xf32> to vector<8x16xbf16>
    %c0_116 = arith.constant 0 : index
    %c0_117 = arith.constant 0 : index
    %c24_118 = arith.constant 24 : index
    %197 = vector.load %arg10[%c0_116, %c0_117, %c24_118] : memref<2x16x32xbf16, #tpu.memory_space<vmem>>, vector<1x16x8xbf16>
    %198 = vector.shape_cast %197 : vector<1x16x8xbf16> to vector<16x8xbf16>
    %cst_119 = arith.constant dense<0.000000e+00> : vector<8x8xf32>
    %199 = tpu.matmul %196, %198, %cst_119 {dimension_numbers = #tpu.dot_dimension_numbers<[1], [0], [0], [1], [0, 0, 1, 1], [], []>} : vector<8x16xbf16>, vector<16x8xbf16>, vector<8x8xf32> -> vector<8x8xf32>
    %200 = arith.truncf %199 : vector<8x8xf32> to vector<8x8xbf16>
    %201 = vector.extract_strided_slice %158 {offsets = [24, 0], sizes = [8, 32], strides = [1, 1]} : vector<32x32xbf16> to vector<8x32xbf16>
    %cst_120 = arith.constant dense<0.000000e+00> : vector<8x32xf32>
    %202 = tpu.matmul %200, %201, %cst_120 {dimension_numbers = #tpu.dot_dimension_numbers<[1], [0], [0], [1], [0, 0, 1, 1], [], []>} : vector<8x8xbf16>, vector<8x32xbf16>, vector<8x32xf32> -> vector<8x32xf32>
    %203 = arith.addf %192, %202 : vector<8x32xf32>
    %c0_121 = arith.constant 0 : index
    %c0_122 = arith.constant 0 : index
    %c0_123 = arith.constant 0 : index
    %204 = vector.load %arg8[%c0_121, %c0_122, %c0_123] : memref<2x8x32xf32, #tpu.memory_space<vmem>>, vector<1x8x32xf32>
    %205 = vector.shape_cast %204 : vector<1x8x32xf32> to vector<8x32xf32>
    %206 = vector.shape_cast %203 : vector<8x32xf32> to vector<1x8x32xf32>
    tpu.vector_store %arg8[%c0_121, %c0_122, %c0_123], %206 {strides = array<i32>} : memref<2x8x32xf32, #tpu.memory_space<vmem>>, vector<1x8x32xf32>,
    %cst_124 = arith.constant 0.000000e+00 : f32
    %207 = vector.broadcast %cst_124 : f32 to vector<8x32xf32>
    %c4_125 = arith.constant 4 : index
    %c0_126 = arith.constant 0 : index
    %c0_127 = arith.constant 0 : index
    %208 = vector.load %arg11[%c4_125, %c0_126, %c0_127] : memref<8x8x16xf32, #tpu.memory_space<vmem>>, vector<1x8x16xf32>
    %209 = vector.shape_cast %208 : vector<1x8x16xf32> to vector<8x16xf32>
    %210 = arith.mulf %209, %156 : vector<8x16xf32>
    %211 = arith.truncf %210 : vector<8x16xf32> to vector<8x16xbf16>
    %c1_128 = arith.constant 1 : index
    %c0_129 = arith.constant 0 : index
    %c0_130 = arith.constant 0 : index
    %212 = vector.load %arg10[%c1_128, %c0_129, %c0_130] : memref<2x16x32xbf16, #tpu.memory_space<vmem>>, vector<1x16x8xbf16>
    %213 = vector.shape_cast %212 : vector<1x16x8xbf16> to vector<16x8xbf16>
    %cst_131 = arith.constant dense<0.000000e+00> : vector<8x8xf32>
    %214 = tpu.matmul %211, %213, %cst_131 {dimension_numbers = #tpu.dot_dimension_numbers<[1], [0], [0], [1], [0, 0, 1, 1], [], []>} : vector<8x16xbf16>, vector<16x8xbf16>, vector<8x8xf32> -> vector<8x8xf32>
    %215 = arith.truncf %214 : vector<8x8xf32> to vector<8x8xbf16>
    %216 = vector.extract_strided_slice %158 {offsets = [0, 0], sizes = [8, 32], strides = [1, 1]} : vector<32x32xbf16> to vector<8x32xbf16>
    %cst_132 = arith.constant dense<0.000000e+00> : vector<8x32xf32>
    %217 = tpu.matmul %215, %216, %cst_132 {dimension_numbers = #tpu.dot_dimension_numbers<[1], [0], [0], [1], [0, 0, 1, 1], [], []>} : vector<8x8xbf16>, vector<8x32xbf16>, vector<8x32xf32> -> vector<8x32xf32>
    %218 = arith.addf %207, %217 : vector<8x32xf32>
    %c5_133 = arith.constant 5 : index
    %c0_134 = arith.constant 0 : index
    %c0_135 = arith.constant 0 : index
    %219 = vector.load %arg11[%c5_133, %c0_134, %c0_135] : memref<8x8x16xf32, #tpu.memory_space<vmem>>, vector<1x8x16xf32>
    %220 = vector.shape_cast %219 : vector<1x8x16xf32> to vector<8x16xf32>
    %221 = arith.mulf %220, %156 : vector<8x16xf32>
    %222 = arith.truncf %221 : vector<8x16xf32> to vector<8x16xbf16>
    %c1_136 = arith.constant 1 : index
    %c0_137 = arith.constant 0 : index
    %c8_138 = arith.constant 8 : index
    %223 = vector.load %arg10[%c1_136, %c0_137, %c8_138] : memref<2x16x32xbf16, #tpu.memory_space<vmem>>, vector<1x16x8xbf16>
    %224 = vector.shape_cast %223 : vector<1x16x8xbf16> to vector<16x8xbf16>
    %cst_139 = arith.constant dense<0.000000e+00> : vector<8x8xf32>
    %225 = tpu.matmul %222, %224, %cst_139 {dimension_numbers = #tpu.dot_dimension_numbers<[1], [0], [0], [1], [0, 0, 1, 1], [], []>} : vector<8x16xbf16>, vector<16x8xbf16>, vector<8x8xf32> -> vector<8x8xf32>
    %226 = arith.truncf %225 : vector<8x8xf32> to vector<8x8xbf16>
    %227 = vector.extract_strided_slice %158 {offsets = [8, 0], sizes = [8, 32], strides = [1, 1]} : vector<32x32xbf16> to vector<8x32xbf16>
    %cst_140 = arith.constant dense<0.000000e+00> : vector<8x32xf32>
    %228 = tpu.matmul %226, %227, %cst_140 {dimension_numbers = #tpu.dot_dimension_numbers<[1], [0], [0], [1], [0, 0, 1, 1], [], []>} : vector<8x8xbf16>, vector<8x32xbf16>, vector<8x32xf32> -> vector<8x32xf32>
    %229 = arith.addf %218, %228 : vector<8x32xf32>
    %c6_141 = arith.constant 6 : index
    %c0_142 = arith.constant 0 : index
    %c0_143 = arith.constant 0 : index
    %230 = vector.load %arg11[%c6_141, %c0_142, %c0_143] : memref<8x8x16xf32, #tpu.memory_space<vmem>>, vector<1x8x16xf32>
    %231 = vector.shape_cast %230 : vector<1x8x16xf32> to vector<8x16xf32>
    %232 = arith.mulf %231, %156 : vector<8x16xf32>
    %233 = arith.truncf %232 : vector<8x16xf32> to vector<8x16xbf16>
    %c1_144 = arith.constant 1 : index
    %c0_145 = arith.constant 0 : index
    %c16_146 = arith.constant 16 : index
    %234 = vector.load %arg10[%c1_144, %c0_145, %c16_146] : memref<2x16x32xbf16, #tpu.memory_space<vmem>>, vector<1x16x8xbf16>
    %235 = vector.shape_cast %234 : vector<1x16x8xbf16> to vector<16x8xbf16>
    %cst_147 = arith.constant dense<0.000000e+00> : vector<8x8xf32>
    %236 = tpu.matmul %233, %235, %cst_147 {dimension_numbers = #tpu.dot_dimension_numbers<[1], [0], [0], [1], [0, 0, 1, 1], [], []>} : vector<8x16xbf16>, vector<16x8xbf16>, vector<8x8xf32> -> vector<8x8xf32>
    %237 = arith.truncf %236 : vector<8x8xf32> to vector<8x8xbf16>
    %238 = vector.extract_strided_slice %158 {offsets = [16, 0], sizes = [8, 32], strides = [1, 1]} : vector<32x32xbf16> to vector<8x32xbf16>
    %cst_148 = arith.constant dense<0.000000e+00> : vector<8x32xf32>
    %239 = tpu.matmul %237, %238, %cst_148 {dimension_numbers = #tpu.dot_dimension_numbers<[1], [0], [0], [1], [0, 0, 1, 1], [], []>} : vector<8x8xbf16>, vector<8x32xbf16>, vector<8x32xf32> -> vector<8x32xf32>
    %240 = arith.addf %229, %239 : vector<8x32xf32>
    %c7_149 = arith.constant 7 : index
    %c0_150 = arith.constant 0 : index
    %c0_151 = arith.constant 0 : index
    %241 = vector.load %arg11[%c7_149, %c0_150, %c0_151] : memref<8x8x16xf32, #tpu.memory_space<vmem>>, vector<1x8x16xf32>
    %242 = vector.shape_cast %241 : vector<1x8x16xf32> to vector<8x16xf32>
    %243 = arith.mulf %242, %156 : vector<8x16xf32>
    %244 = arith.truncf %243 : vector<8x16xf32> to vector<8x16xbf16>
    %c1_152 = arith.constant 1 : index
    %c0_153 = arith.constant 0 : index
    %c24_154 = arith.constant 24 : index
    %245 = vector.load %arg10[%c1_152, %c0_153, %c24_154] : memref<2x16x32xbf16, #tpu.memory_space<vmem>>, vector<1x16x8xbf16>
    %246 = vector.shape_cast %245 : vector<1x16x8xbf16> to vector<16x8xbf16>
    %cst_155 = arith.constant dense<0.000000e+00> : vector<8x8xf32>
    %247 = tpu.matmul %244, %246, %cst_155 {dimension_numbers = #tpu.dot_dimension_numbers<[1], [0], [0], [1], [0, 0, 1, 1], [], []>} : vector<8x16xbf16>, vector<16x8xbf16>, vector<8x8xf32> -> vector<8x8xf32>
    %248 = arith.truncf %247 : vector<8x8xf32> to vector<8x8xbf16>
    %249 = vector.extract_strided_slice %158 {offsets = [24, 0], sizes = [8, 32], strides = [1, 1]} : vector<32x32xbf16> to vector<8x32xbf16>
    %cst_156 = arith.constant dense<0.000000e+00> : vector<8x32xf32>
    %250 = tpu.matmul %248, %249, %cst_156 {dimension_numbers = #tpu.dot_dimension_numbers<[1], [0], [0], [1], [0, 0, 1, 1], [], []>} : vector<8x8xbf16>, vector<8x32xbf16>, vector<8x32xf32> -> vector<8x32xf32>
    %251 = arith.addf %240, %250 : vector<8x32xf32>
    %c1_157 = arith.constant 1 : index
    %c0_158 = arith.constant 0 : index
    %c0_159 = arith.constant 0 : index
    %252 = vector.load %arg8[%c1_157, %c0_158, %c0_159] : memref<2x8x32xf32, #tpu.memory_space<vmem>>, vector<1x8x32xf32>
    %253 = vector.shape_cast %252 : vector<1x8x32xf32> to vector<8x32xf32>
    %254 = vector.shape_cast %251 : vector<8x32xf32> to vector<1x8x32xf32>
    tpu.vector_store %arg8[%c1_157, %c0_158, %c0_159], %254 {strides = array<i32>} : memref<2x8x32xf32, #tpu.memory_space<vmem>>, vector<1x8x32xf32>,
    return
  }
  func.func @transform_0(%arg0: i32) -> (i32, i32, i32) {
    %c0_i32 = arith.constant 0 : i32
    %c0_i32_0 = arith.constant 0 : i32
    %c0_i32_1 = arith.constant 0 : i32
    return %c0_i32, %arg0, %c0_i32_0 : i32, i32, i32
  }
  func.func @transform_1(%arg0: i32) -> (i32, i32, i32) {
    %c0_i32 = arith.constant 0 : i32
    %c0_i32_0 = arith.constant 0 : i32
    %c0_i32_1 = arith.constant 0 : i32
    %c0_i32_2 = arith.constant 0 : i32
    return %c0_i32, %c0_i32_0, %c0_i32_1 : i32, i32, i32
  }
  func.func @transform_2(%arg0: i32) -> (i32, i32, i32) {
    %c0_i32 = arith.constant 0 : i32
    %c0_i32_0 = arith.constant 0 : i32
    %c0_i32_1 = arith.constant 0 : i32
    %c0_i32_2 = arith.constant 0 : i32
    return %c0_i32, %c0_i32_0, %c0_i32_1 : i32, i32, i32
  }
  func.func @transform_3(%arg0: i32) -> (i32, i32) {
    %c0_i32 = arith.constant 0 : i32
    %c0_i32_0 = arith.constant 0 : i32
    %c0_i32_1 = arith.constant 0 : i32
    return %c0_i32, %c0_i32_0 : i32, i32
  }
  func.func @transform_4(%arg0: i32) -> (i32, i32) {
    %c0_i32 = arith.constant 0 : i32
    %c0_i32_0 = arith.constant 0 : i32
    %c0_i32_1 = arith.constant 0 : i32
    return %c0_i32, %c0_i32_0 : i32, i32
  }
  func.func @transform_5(%arg0: i32) -> (i32, i32) {
    %c0_i32 = arith.constant 0 : i32
    %c0_i32_0 = arith.constant 0 : i32
    %c0_i32_1 = arith.constant 0 : i32
    return %c0_i32, %c0_i32_0 : i32, i32
  }
  func.func @transform_6(%arg0: i32) -> (i32, i32) {
    %c0_i32 = arith.constant 0 : i32
    %c0_i32_0 = arith.constant 0 : i32
    %c0_i32_1 = arith.constant 0 : i32
    return %c0_i32, %c0_i32_0 : i32, i32
  }
  func.func @transform_7(%arg0: i32) -> (i32, i32, i32) {
    %c0_i32 = arith.constant 0 : i32
    %c0_i32_0 = arith.constant 0 : i32
    %c0_i32_1 = arith.constant 0 : i32
    return %c0_i32, %arg0, %c0_i32_0 : i32, i32, i32
  }
}

</mosaic_0001>

<bundles_post_ra>
// kernel: tpu_custom_call.1
= control target key start
LH: loop header
LB: loop body
LE: loop exit
PB: predicated region body
PF: predicated region fallthrough
CT: control target
= control target key end

     0   :  { %s3284_s0 = inlined_call_operand.hbm [shape: f32[2,16,16], index: 0, kind: input, shape index: {}]   ;;  %s3285_s1 = inlined_call_operand.hbm [shape: f32[2,16,16], index: 1, kind: input, shape index: {}]   ;;  %s3286_s2 = inlined_call_operand.hbm [shape: f32[2,16,16], index: 2, kind: input, shape index: {}]   ;;  %s3287_s3 = inlined_call_operand.hbm [shape: f32[16,32], index: 3, kind: input, shape index: {}]   ;;  %s3288_s4 = inlined_call_operand.hbm [shape: f32[16,32], index: 4, kind: input, shape index: {}]   ;;  %s3289_s5 = inlined_call_operand.hbm [shape: f32[16,32], index: 5, kind: input, shape index: {}]   ;;  %s3290_s6 = inlined_call_operand.hbm [shape: f32[32,32], index: 6, kind: input, shape index: {}]   ;;  %s3291_s7 = inlined_call_operand.hbm [shape: f32[2,16,32], index: 7, kind: output, shape index: {}]  }
   0x1   :  { %3298 = sst [smem:[#allocation23_spill]] %s3285_s1 }
   0x2   :  { %12 = vsyncpa [#allocation6], 0 }
   0x3   :  { %14 = vsyncpa [#allocation6 + $0x1], 0 }
   0x4   :  { %15 = vsyncpa [#allocation9], 0 }
   0x5   :  { %16 = vsyncpa [#allocation12], 0 }
   0x6   :  { %17 = vsyncpa [#allocation15], 0 }
   0x7   :  { %18 = vsyncpa [#allocation7], 0 }
   0x8   :  { %20 = vsyncpa [#allocation7 + $0x1], 0  ;;  %s2830_s24 = smov 0   ;;  %s2832_s25 = smov 0  }
   0x9   :  { %s2834_s26 = smov 0   ;;  %s2836_s27 = smov 0  }
   0xa LB: > { %s2771_s28 = smov [#allocation8]   ;;  %s2851_s30 = sadd.s32 4294967295, %s2769_s27   ;;  %s2769_s27 = sphi %s2836_s27, %s3325_s27   ;;  %s2765_s26 = sphi %s2834_s26, %s3324_s26   ;;  %s2761_s25 = sphi %s2832_s25, %s3323_s25   ;;  %s2757_s24 = sphi %s2830_s24, %s3322_s24  }
   0xb   : > { %s221_s29 = sshll.u32 %s2771_s28, 4  ;;  %p2065_p0 = scmp.ge.s32.totalorder %s2769_s27, 1  ;;  %s222_s29 = int_to_ptr.vmem [resolvable:$true] %s221_s29 }
   0xc   : > { %p3294_p1 = scmp.eq.s32.totalorder %s2851_s30, 0  ;;  %p209_p2 = scmp.lt.s32.totalorder %s2769_s27, 3 }
   0xd   : > { %s2772_s9 = smov [#allocation11]   ;;  %s2773_s12 = smov [#allocation14]  }
   0xe   : > { %p2857_p4 = pnand %p2065_p0, %p209_p2  ;;  %s247_s10 = sshll.u32 %s2772_s9, 4  ;;  %s2870_s10 = int_to_ptr.vmem [resolvable:$true] %s247_s10 }
   0xf   : > { %s273_s13 = sshll.u32 %s2773_s12, 4  ;;  %s2520_s15 = scalar_lea.vmem %s222_s29, 512  ;;  %s2872_s13 = int_to_ptr.vmem [resolvable:$true] %s273_s13 }
  0x10   : > { %s3299_s8 = scalar_select %p2857_p4, 1, 0 }
  0x11   : > { %p2391_p6 = pneg %p2857_p4  ;;  %p2521_p9 = scmp.ne.s32.totalorder %s222_s29, %s2520_s15 }
  0x12   : > { %p2528_p12 = scmp.lt.s32.totalorder %s222_s29, %s222_s29  ;;  %p2529_p13 = scmp.lt.s32.totalorder %s2520_s15, %s2520_s15 }
  0x13   : > { %p2866_p7 = pnand %p2391_p6, %p3294_p1 }
  0x14   : > { %p2530_p0 = por %p2529_p13, %p2528_p12 }
  0x15   : > { %p2876_p8 = pneg %p2866_p7 }
  0x17   : > { %p2523_p10 = pnand %p2521_p9, %p2876_p8 }
  0x19   : > { %p2524_p11 = pneg %p2523_p10 }
  0x1b   : > { %p2531_p2 = pnand %p2530_p0, %p2524_p11 }
  0x1d   : > { %2534 = shalt.err (!%p2531_p2)
}
  0x1e   : > { %s3292_s16 = smov 128   ;;  %s3293_s17 = smov 8  }
  0x1f   : > { %s3302_s1 = sld [smem:[#allocation23_spill]]  ;;  %s2546_s20 = scalar_lea.vmem %s2870_s10, 256 }
  0x20   : > { %p2547_p6 = scmp.ne.s32.totalorder %s2870_s10, %s2546_s20  ;;  %p2554_p11 = scmp.lt.s32.totalorder %s2870_s10, %s2870_s10 }
  0x21   : > { %p2555_p12 = scmp.lt.s32.totalorder %s2546_s20, %s2546_s20 }
  0x22   : > { %p2549_p9 = pnand %p2547_p6, %p2876_p8 }
  0x23   : > { %p2556_p13 = por %p2555_p12, %p2554_p11 }
  0x24   : > { %p2550_p10 = pneg %p2549_p9 }
  0x25   : > { %2394 = dma.hbm_to_vmem [thread:$0]  (!%p2866_p7), %s3302_s1, 512, %s222_s29, [#allocation9], %s3292_s16, %s3292_s16, %s3293_s17  }
  0x26   : > { %p2557_p0 = pnand %p2556_p13, %p2550_p10 }
  0x28   : > { %2560 = shalt.err (!%p2557_p0)
}
  0x29   : > { %2400 = dma.hbm_to_vmem [thread:$0]  (!%p2866_p7), %s3287_s3, 256, %s2870_s10, [#allocation12], %s3292_s16, %s3292_s16, %s3293_s17  }
  0x2a   : > { %s2572_s23 = scalar_lea.vmem %s2872_s13, 256  ;;  %p2580_p10 = scmp.lt.s32.totalorder %s2872_s13, %s2872_s13 }
  0x2b   : > { %p2573_p2 = scmp.ne.s32.totalorder %s2872_s13, %s2572_s23  ;;  %p2581_p11 = scmp.lt.s32.totalorder %s2572_s23, %s2572_s23 }
  0x2d   : > { %p2575_p6 = pnand %p2573_p2, %p2876_p8  ;;  %p2582_p12 = por %p2581_p11, %p2580_p10 }
  0x2f   : > { %p2576_p9 = pneg %p2575_p6 }
  0x31   : > { %p2583_p13 = pnand %p2582_p12, %p2576_p9 }
  0x33   : > { %2586 = shalt.err (!%p2583_p13)
}
  0x34   : > { %2406 = dma.hbm_to_vmem [thread:$0]  (!%p2866_p7), %s3289_s5, 256, %s2872_s13, [#allocation15], %s3292_s16, %s3292_s16, %s3293_s17  }
  0x35   : > { %s2776_s9 = smov [#allocation10]   ;;  %s2777_s12 = smov [#allocation13]  }
  0x36   : > { %s234_s10 = sshll.u32 %s2776_s9, 4  ;;  %s260_s15 = sshll.u32 %s2777_s12, 4  ;;  %s235_s10 = int_to_ptr.vmem [resolvable:$true] %s234_s10  ;;  %s261_s15 = int_to_ptr.vmem [resolvable:$true] %s260_s15 }
  0x37   : > { %s2598_s18 = scalar_lea.vmem %s235_s10, 512  ;;  %p2606_p9 = scmp.lt.s32.totalorder %s235_s10, %s235_s10 }
  0x38   : > { %p2599_p0 = scmp.ne.s32.totalorder %s235_s10, %s2598_s18  ;;  %p2607_p10 = scmp.lt.s32.totalorder %s2598_s18, %s2598_s18 }
  0x3a   : > { %p2601_p2 = pnand %p2599_p0, %p2876_p8  ;;  %p2608_p11 = por %p2607_p10, %p2606_p9 }
  0x3c   : > { %p2602_p6 = pneg %p2601_p2 }
  0x3e   : > { %p2609_p12 = pnand %p2608_p11, %p2602_p6 }
  0x40   : > { %2612 = shalt.err (!%p2609_p12)
}
  0x41   : > { %2397 = dma.hbm_to_vmem [thread:$0]  (!%p2866_p7), %s3286_s2, 512, %s235_s10, [#allocation9], %s3292_s16, %s3292_s16, %s3293_s17  }
  0x42   : > { %s2624_s20 = scalar_lea.vmem %s261_s15, 256  ;;  %p2632_p5 = scmp.lt.s32.totalorder %s261_s15, %s261_s15 }
  0x43   : > { %p2625_p13 = scmp.ne.s32.totalorder %s261_s15, %s2624_s20  ;;  %p2633_p9 = scmp.lt.s32.totalorder %s2624_s20, %s2624_s20 }
  0x45   : > { %p2627_p0 = pnand %p2625_p13, %p2876_p8  ;;  %p2634_p6 = por %p2633_p9, %p2632_p5 }
  0x47   : > { %p2628_p2 = pneg %p2627_p0 }
  0x49   : > { %p2635_p10 = pnand %p2634_p6, %p2628_p2 }
  0x4b   : > { %2638 = shalt.err (!%p2635_p10)
}
  0x4c   : > { %2403 = dma.hbm_to_vmem [thread:$0]  (!%p2866_p7), %s3288_s4, 256, %s261_s15, [#allocation12], %s3292_s16, %s3292_s16, %s3293_s17  }
  0x4d   : > { %s2778_s23 = smov [#allocation16]  }
  0x4e   : > { %s286_s28 = sshll.u32 %s2778_s23, 4  ;;  %s287_s28 = int_to_ptr.vmem [resolvable:$true] %s286_s28 }
  0x4f   : > { %s2650_s29 = scalar_lea.vmem %s287_s28, 512  ;;  %p2658_p13 = scmp.lt.s32.totalorder %s287_s28, %s287_s28 }
  0x50   : > { %p2651_p11 = scmp.ne.s32.totalorder %s287_s28, %s2650_s29  ;;  %p2659_p0 = scmp.lt.s32.totalorder %s2650_s29, %s2650_s29 }
  0x52   : > { %p2653_p12 = pnand %p2651_p11, %p2876_p8  ;;  %p2660_p2 = por %p2659_p0, %p2658_p13 }
  0x54   : > { %p2654_p5 = pneg %p2653_p12 }
  0x56   : > { %p2661_p9 = pnand %p2660_p2, %p2654_p5 }
  0x58   : > { %2664 = shalt.err (!%p2661_p9)
}
  0x59   : > { %2409 = dma.hbm_to_vmem [thread:$0]  (!%p2866_p7), %s3290_s6, 512, %s287_s28, [#allocation15], %s3292_s16, %s3292_s16, %s3293_s17  }
  0x5a   : > { %s2064_s11 = sadd.s32 4294967294, %s2769_s27   ;;  %s2952_s14 = sadd.s32 1, %s2769_s27  }
  0x5b   : > { %s30_s12 = ssub.s32 %s2769_s27, %s2952_s14  ;;  %s33_s15 = sadd.s32 1, %s2765_s26 }
  0x5c   : > { %p31_p8 = scmp.eq.s32.totalorder %s30_s12, 0  ;;  %p40_p6 = scmp.ne.s32.totalorder %s2765_s26, %s2761_s25 }
  0x5d   : > { %p41_p10 = scmp.eq.s32.totalorder %s2769_s27, 0  ;;  %p46_p11 = scmp.ne.s32.totalorder %s2761_s25, %s2757_s24 }
  0x5e   : > { %s2963_s18 = scalar_select %p31_p8, %s2765_s26, %s33_s15  }
  0x5f   : > { %p2965_p12 = por %p41_p10, %p40_p6  ;;  %p2971_p7 = por %p3294_p1, %p46_p11 }
  0x60   : > { %p196_p5 = scmp.eq.s32.totalorder %s2851_s30, 1  ;;  %p202_p13 = scmp.eq.s32.totalorder %s2064_s11, 1 }
  0x61   : > { %s3304_s19 = scalar_select %p2971_p7, 1, 0 }
  0x62   : > { %p2424_p0 = scmp.lt.s32.totalorder %s2769_s27, 2  ;;  %s300_s20 = sand.u32 1, %s2765_s26  }
  0x63   : > { %p2978_p2 = por %p196_p5, %p40_p6  ;;  %p2982_p9 = por %p202_p13, %p46_p11 }
  0x64   : > { %s2073_s23 = sshll.u32 %s300_s20, 4  ;;  %s2074_s28 = sshll.u32 %s2769_s27, 7 }
  0x65   : > { %s3305_s21 = scalar_select %p2978_p2, 1, 0 }
  0x66   : > { %s3306_s22 = scalar_select %p2982_p9, 1, 0 }
  0x67   : > { %s2990_s10 = scalar_lea.hbm %s3284_s0, %s2074_s28  ;;  %s304_s11 = scalar_lea.vmem [#allocation5], %s2073_s23 }
  0x68   : > { %s310_s12 = sshll.u32 %s304_s11, 4  ;;  %p2996_p8 = pnand %p2424_p0, %p2965_p12  ;;  %s2992_s12 = int_to_ptr.vmem [resolvable:$true] %s310_s12 }
  0x69   : > { %s3000_s16 = scalar_lea.sflag [#allocation6], %s300_s20  ;;  %s2665_s17 = scalar_lea.hbm %s2990_s10, 256 }
  0x6a   : > { %p2666_p6 = scmp.ne.s32.totalorder %s2990_s10, %s2665_s17  ;;  %p2667_p10 = pneg %p2996_p8 }
  0x6b   : > { %s2670_s23 = scalar_lea.hbm %s3284_s0, 512  ;;  %p2671_p12 = scmp.lt.s32.totalorder %s2990_s10, %s3284_s0 }
  0x6c   : > { %p2668_p11 = pnand %p2667_p10, %p2666_p6  ;;  %p2672_p13 = scmp.lt.s32.totalorder %s2670_s23, %s2665_s17 }
  0x6e   : > { %p2669_p5 = pneg %p2668_p11  ;;  %p2673_p0 = por %p2672_p13, %p2671_p12 }
  0x70   : > { %p2674_p3 = pnand %p2673_p0, %p2669_p5 }
  0x72   : > { %2677 = shalt.err (!%p2674_p3)
}
  0x73   : > { %s2678_s13 = scalar_lea.vmem %s2992_s12, 256  ;;  %s2779_s20 = smov [#allocation5]  }
  0x74   : > { %p2679_p1 = scmp.ne.s32.totalorder %s2992_s12, %s2678_s13  ;;  %s2683_s1 = sshll.u32 %s2779_s20, 4  ;;  %s2684_s1 = int_to_ptr.vmem [resolvable:$false] %s2683_s1 }
  0x75   : > { %s2685_s28 = scalar_lea.vmem %s2684_s1, 512  ;;  %p2686_p11 = scmp.lt.s32.totalorder %s2992_s12, %s2684_s1 }
  0x76   : > { %p2681_p9 = pnand %p2679_p1, %p2667_p10  ;;  %p2687_p2 = scmp.lt.s32.totalorder %s2685_s28, %s2678_s13 }
  0x78   : > { %p2682_p6 = pneg %p2681_p9  ;;  %p2688_p7 = por %p2687_p2, %p2686_p11 }
  0x7a   : > { %p2689_p4 = pnand %p2688_p7, %p2682_p6 }
  0x7c   : > { %2692 = shalt.err (!%p2689_p4)
}
  0x7d   : > { %s2780_s17 = smov 256   ;;  %s3308_s29 = smov 8  }
  0x7e   : > { %s3309_s23 = smov 128   ;;  %p3310_p1 = scmp.ne.s32.totalorder %s3299_s8, 0 }
  0x7f   : > { %2413 = dma.hbm_to_vmem [thread:$0]  (!%p2996_p8), %s2990_s10, 256, %s2992_s12, %s3000_s16, %s2780_s17, %s3309_s23, %s3308_s29  }
  0x80   : > { %322 = sbr.rel (%p3310_p1) target bundleno = 1987 (0x7c3), region = 48  ;;  %s3026_s9 = sand.u32 (!%p3310_p1), 1, %s2761_s25  }
  0x81   : > { %s2076_s1 = sshll.u32 (!%p3310_p1), %s3026_s9, 4  ;;  %s325_s11 = scalar_lea.sflag (!%p3310_p1), [#allocation6], %s3026_s9 }
  0x82   : > { %s3030_s13 = scalar_lea.vmem (!%p3310_p1), [#allocation5], %s2076_s1  ;;  %p3311_p3 = scmp.ne.s32.totalorder (!%p3310_p1), %s3304_s19, 0 }
  0x85   : > { %2736 = dma.done.wait (%p3311_p3), %s325_s11, 256  }
  0x86   : > { %2738 = vsyncadd (%p3311_p3), %s325_s11, 4294967040  ;;  %p3312_p4 = scmp.eq.s32.totalorder %s2851_s30, 0 }
  0x88   : > { %2740 = dma.done.wait (%p3312_p4), [#allocation9], 1024   ;;  %p3313_p7 = pmov %p3312_p4 }
  0x89   : > { %p3314_p2 = pmov %p3312_p4 }
  0x8a   : > { %2742 = vsyncadd (%p3313_p7), [#allocation9], 4294966272 }
  0x8b   : > { %2744 = dma.done.wait (%p3314_p2), [#allocation12], 512   ;;  %p3315_p9 = pmov %p3314_p2 }
  0x8c   : > { %p3316_p8 = pmov %p3314_p2 }
  0x8d   : > { %2746 = vsyncadd (%p3315_p9), [#allocation12], 4294966784 }
  0x8e   : > { %2748 = dma.done.wait (%p3316_p8), [#allocation15], 768   ;;  %p3317_p10 = pmov %p3314_p2 }
  0x8f   : > { %s3048_s8 = scalar_lea.vmem [#allocation17], %s2076_s1  ;;  %p3318_p5 = scmp.ne.s32.totalorder %s2851_s30, 0 }
  0x90   : > { %2750 = vsyncadd (%p3317_p10), [#allocation15], 4294966528 }
  0x91   : > { %387 = sbr.rel (%p3318_p5) target bundleno = 360 (0x168), region = 80 }
  0x96   : > { %v400_v0 = vld [vmem:[#allocation13] sm:$0xff]  ;;  %v401_v1 = vld [vmem:[#allocation13 + $0x8] sm:$0xff]  ;;  %v403_v2 = vld [vmem:[#allocation14] sm:$0xff]  ;;  %vm406_vm0 = vcmask 130048   ;;  %vm533_vm1 = vcmask 257024  }
  0x97   : > { %v402_v3 = vpack.c.bf16 %v401_v1, %v400_v0  ;;  %v404_v4 = vld [vmem:[#allocation14 + $0x8] sm:$0xff]  ;;  %v388_v5 = vld [vmem:[#allocation8] sm:$0xff]  ;;  %v390_v11 = vld [vmem:[#allocation8 + $0x10] sm:$0xff] }
  0x98   : > { %v389_v6 = vld [vmem:[#allocation8 + $0x8] sm:$0xff]  ;;  %v405_v7 = vpack.c.bf16 %v404_v4, %v403_v2  ;;  %v394_v9 = vld [vmem:[#allocation10] sm:$0xff]  ;;  %v391_v13 = vld [vmem:[#allocation8 + $0x18] sm:$0xff] }
  0x99   : > { %v392_v8 = vpack.c.bf16 %v389_v6, %v388_v5  ;;  %v395_v10 = vld [vmem:[#allocation10 + $0x8] sm:$0xff]  ;;  %2201 = vmatprep.subr.bf16.mxu0 %v402_v3  ;;  %v396_v14 = vld [vmem:[#allocation10 + $0x10] sm:$0xff]  ;;  %v397_v15 = vld [vmem:[#allocation10 + $0x18] sm:$0xff]  ;;  %v393_v16 = vpack.c.bf16 %v391_v13, %v390_v11 }
  0x9a   : > { %v398_v12 = vpack.c.bf16 %v395_v10, %v394_v9  ;;  %2207 = vmatprep.subr.bf16.mxu1 %v405_v7  ;;  %2202 = vmatpush3.bf16.msra.mxu0 %v402_v3  ;;  %v399_v17 = vpack.c.bf16 %v397_v15, %v396_v14 }
  0x9b   : > { %2208 = vmatpush3.bf16.msra.mxu1 %v405_v7  ;;  %2203 = vmatprep.mubr.msk.bf16.mxu0 %vm406_vm0, %v392_v8 }
  0x9c   : > { %2209 = vmatprep.mubr.msk.bf16.mxu1 %vm406_vm0, %v398_v12 }
  0x9d   : > { %2204 = vmatmul.mubr.msk.bf16.vlgmr.msra.gmra.mxu0 %vm406_vm0, %v393_v16 }
  0x9e   : > { %2210 = vmatmul.mubr.msk.bf16.vlgmr.msra.gmra.mxu1 %vm406_vm0, %v399_v17 }
 0x15d   : > { %v2205_v18 = vpop.f32.mrf.mxu0 }
 0x15e   : > { %v2139_v19 = vpack.c.bf16 %v2205_v18, %v2205_v18  ;;  %v2211_v20 = vpop.f32.mrf.mxu1 }
 0x15f   : > { %v2143_v21 = vpack.c.bf16 %v2211_v20, %v2211_v20  ;;  %v447_v22 = vpop.f32.mrf.mxu0 }
 0x160   : > { %536 = vst.msk [vmem:[#allocation2 + $0x8] sm:$0xf] %vm533_vm1, %v2139_v19  ;;  %v2137_v23 = vpack.c.bf16 %v447_v22, %v447_v22  ;;  %v502_v24 = vpop.f32.mrf.mxu1 }
 0x161   : > { %556 = vst.msk [vmem:[#allocation3 + $0x8] sm:$0xf] %vm533_vm1, %v2143_v21  ;;  %v2141_v25 = vpack.c.bf16 %v502_v24, %v502_v24  ;;  %v2206_v26 = vpop.f32.mrf.mxu0 }
 0x162   : > { %534 = vst.msk [vmem:[#allocation2] sm:$0xf] %vm533_vm1, %v2137_v23  ;;  %v2140_v27 = vpack.c.bf16 %v2206_v26, %v2206_v26  ;;  %v2212_v28 = vpop.f32.mrf.mxu1 }
 0x163   : > { %554 = vst.msk [vmem:[#allocation3] sm:$0xf] %vm533_vm1, %v2141_v25  ;;  %v2144_v29 = vpack.c.bf16 %v2212_v28, %v2212_v28  ;;  %v450_v30 = vpop.f32.mrf.mxu0 }
 0x164   : > { %537 = vst.msk [vmem:[#allocation2 + $0xc] sm:$0xf] %vm533_vm1, %v2140_v27  ;;  %v2138_v31 = vpack.c.bf16 %v450_v30, %v450_v30  ;;  %v505_v32 = vpop.f32.mrf.mxu1 }
 0x165   : > { %557 = vst.msk [vmem:[#allocation3 + $0xc] sm:$0xf] %vm533_vm1, %v2144_v29  ;;  %v2142_v33 = vpack.c.bf16 %v505_v32, %v505_v32 }
 0x166   : > { %535 = vst.msk [vmem:[#allocation2 + $0x4] sm:$0xf] %vm533_vm1, %v2138_v31 }
 0x167   : > { %555 = vst.msk [vmem:[#allocation3 + $0x4] sm:$0xf] %vm533_vm1, %v2142_v33 }
 0x168 PF: > { %v561_v34 = vld [vmem:[#allocation11] sm:$0xff]  ;;  %v562_v35 = vld [vmem:[#allocation11 + $0x8] sm:$0xff]  ;;  %v2781_v37 = vmov 0.0   ;;  %vm2782_vm2 = vmmov 0   ;;  %vm564_vm3 = vcmask 130048   ;;  %s2783_s16 = smov 120  }
 0x169   : > { %v558_v36 = vld [vmem:[%s3030_s13] sm:$0xff]  ;;  %2213 = vmatprep.subr.bf16.mxu0 %v2781_v37  ;;  %v563_v38 = vpack.c.bf16 %v562_v35, %v561_v34  ;;  %2215 = vmatprep.mubr.msk.bf16.mxu0 %vm2782_vm2, %v2781_v37  ;;  %v559_v39 = vld [vmem:[%s3030_s13 + $0x8] sm:$0xff]  ;;  %vm619_vm4 = vcmask 64512   ;;  %s2784_s19 = smov 112   ;;  %s2785_s10 = smov 104   ;;  %vm1251_vm5 = vcmask 1043456  }
 0x16a   : > { %v560_v40 = vpack.c.bf16 %v559_v39, %v558_v36  ;;  %2219 = vmatprep.subr.bf16.mxu1 %v2781_v37  ;;  %2221 = vmatprep.mubr.msk.bf16.mxu1 %vm2782_vm2, %v2781_v37  ;;  %vm1537_vm6 = vcmask 261120   ;;  %s2134_s12 = sshll.u32 %s2851_s30, 7  ;;  %s1934_s15 = sshll.u32 %s3048_s8, 4  ;;  %s3239_s15 = int_to_ptr.vmem [resolvable:$true] %s1934_s15 }
 0x16b   : > { %2214 = vmatpush3.bf16.msra.mxu0 %v563_v38  ;;  %v2484_v56 = vld [vmem:[#allocation2 + $0x8] sm:$0xff]   ;;  %s3237_s17 = scalar_lea.hbm %s3291_s7, %s2134_s12  ;;  %s1922_s30 = scalar_lea.sflag [#allocation7], %s3026_s9 }
 0x16c   : > { %2225 = vmatprep.subr.bf16.mxu0 %v2781_v37  ;;  %v2486_v59 = vld [vmem:[#allocation2 + $0x8] sm:$0xff]   ;;  %s2693_s29 = scalar_lea.vmem %s3239_s15, 256  ;;  %p3319_p13 = scmp.ne.s32.totalorder %s3305_s21, 0 }
 0x16d   : > { %v2481_v41 = vld [vmem:[#allocation2] sm:$0xff]   ;;  %v2487_v60 = vld [vmem:[#allocation2 + $0x8] sm:$0xff]   ;;  %p2694_p12 = scmp.ne.s32.totalorder %s3239_s15, %s2693_s29  ;;  %s2786_s23 = smov [#allocation17]  }
 0x16e   : > { %677 = vrot.lane.b32.xlu0 %v2481_v41, %s2783_s16  ;;  %2216 = vmatmul.mubr.msk.bf16.vlgmr.msra.gmra.mxu0 %vm564_vm3, %v560_v40  ;;  %v2482_v42 = vld [vmem:[#allocation2] sm:$0xff]   ;;  %v2489_v61 = vld [vmem:[#allocation3] sm:$0xff]   ;;  %v2488_v62 = vld [vmem:[#allocation2 + $0x8] sm:$0xff]   ;;  %s2697_s1 = sshll.u32 %s2786_s23, 4  ;;  %s2698_s1 = int_to_ptr.vmem [resolvable:$false] %s2697_s1 }
 0x16f   : > { %2227 = vmatprep.mubr.msk.bf16.mxu0 %vm2782_vm2, %v2781_v37  ;;  %v2483_v43 = vld [vmem:[#allocation2] sm:$0xff]   ;;  %v861_v63 = vsel %vm619_vm4, %v2488_v62, 0  ;;  %p2695_p0 = pnand %p2694_p12, %p3319_p13  ;;  %s2699_s11 = scalar_lea.vmem %s2698_s1, 512 }
 0x170   : > { %v624_v44 = vsel %vm619_vm4, %v2483_v43, 0  ;;  %v2485_v57 = vld [vmem:[#allocation2] sm:$0xff]   ;;  %p2700_p11 = scmp.lt.s32.totalorder %s3239_s15, %s2698_s1  ;;  %p2701_p1 = scmp.lt.s32.totalorder %s2699_s11, %s2693_s29 }
 0x171   : > { %2220 = vmatpush3.bf16.xpose.msra.mxu1 %v624_v44  ;;  %p2696_p6 = pneg %p2695_p0 }
 0x172   : > { %737 = vrot.lane.b32.xlu0 %v2482_v42, %s2784_s19  ;;  %2231 = vmatprep.subr.bf16.mxu1 %v2781_v37  ;;  %p2702_p3 = por %p2701_p1, %p2700_p11 }
 0x174   : > { %p2703_p4 = pnand %p2702_p3, %p2696_p6 }
 0x1e0   : > { %v678_v45 = vpop.permute.xlu0 %677 }
 0x1e1   : > { %v683_v46 = vsel %vm619_vm4, %v678_v45, 0 }
 0x1e2   : > { %2226 = vmatpush3.bf16.xpose.msra.mxu0 %v683_v46 }
 0x1e3   : > { %2237 = vmatprep.subr.bf16.mxu0 %v2781_v37 }
 0x1e4   : > { %v738_v52 = vpop.permute.xlu0 %737 }
 0x1e5   : > { %v743_v55 = vsel %vm619_vm4, %v738_v52, 0 }
 0x22e   : > { %v602_v47 = vpop.f32.mrf.mxu0 }
 0x22f   : > { %v609_v50 = vmul.f32 0.35355338, %v602_v47 }
 0x230   : > { %v2217_v48 = vpop.f32.mrf.mxu0 }
 0x232   : > { %v605_v49 = vpop.f32.mrf.mxu0 }
 0x233   : > { %v610_v51 = vmul.f32 0.35355338, %v605_v49 }
 0x234   : > { %v2218_v53 = vpop.f32.mrf.mxu0 }
 0x235   : > { %v611_v54 = vpack.c.bf16 %v610_v51, %v609_v50 }
 0x237   : > { %730 = vrot.lane.b32.xlu0 %v611_v54, %s2784_s19  ;;  %670 = vrot.lane.b32.xlu1 %v611_v54, %s2783_s16  ;;  %v851_v58 = vrot.slane %v611_v54, 4 }
 0x238   : > { %2222 = vmatmul.mubr.msk.bf16.vlgmr.msra.gmra.mxu1 %vm619_vm4, %v611_v54 }
 0x239   : > { %2232 = vmatpush3.bf16.xpose.msra.mxu1 %v743_v55  ;;  %2233 = vmatprep.mubr.msk.bf16.mxu1 %vm2782_vm2, %v2781_v37 }
 0x23a   : > { %2243 = vmatprep.subr.bf16.mxu1 %v2781_v37 }
 0x23b   : > { %915 = vrot.lane.b32.xlu0 %v2484_v56, %s2783_s16  ;;  %797 = vrot.lane.b32.xlu1 %v2485_v57, %s2785_s10 }
 0x23f   : > { %790 = vrot.lane.b32.xlu1 %v611_v54, %s2785_s10  ;;  %908 = vrot.lane.b32.xlu0 %v851_v58, %s2783_s16 }
 0x243   : > { %975 = vrot.lane.b32.xlu1 %v2486_v59, %s2784_s19  ;;  %968 = vrot.lane.b32.xlu0 %v851_v58, %s2784_s19 }
 0x247   : > { %1035 = vrot.lane.b32.xlu1 %v2487_v60, %s2785_s10  ;;  %1199 = vrot.lane.b32.xlu0 %v2489_v61, %s2783_s16 }
 0x24b   : > { %1028 = vrot.lane.b32.xlu1 %v851_v58, %s2785_s10  ;;  %1441 = vrot.lane.b32.xlu0 %v2489_v61, %s2785_s10 }
 0x24f   : > { %1344 = vrot.lane.b32.xlu1 %v2489_v61, %s2784_s19 }
 0x2a9   : > { %v731_v0 = vpop.permute.xlu0 %730  ;;  %v671_v1 = vpop.permute.xlu1 %670 }
 0x2aa   : > { %2228 = vmatmul.mubr.msk.bf16.vlgmr.msra.gmra.mxu0 %vm619_vm4, %v671_v1  ;;  %2234 = vmatmul.mubr.msk.bf16.vlgmr.msra.gmra.mxu1 %vm619_vm4, %v731_v0 }
 0x2ab   : > { %2244 = vmatpush3.bf16.xpose.msra.mxu1 %v861_v63  ;;  %2245 = vmatprep.mubr.msk.bf16.mxu1 %vm2782_vm2, %v2781_v37 }
 0x2ac   : > { %2239 = vmatprep.mubr.msk.bf16.mxu0 %vm2782_vm2, %v2781_v37  ;;  %2255 = vmatprep.subr.bf16.mxu1 %v2781_v37 }
 0x2ad   : > { %v798_v2 = vpop.permute.xlu1 %797  ;;  %v916_v4 = vpop.permute.xlu0 %915 }
 0x2ae   : > { %v803_v3 = vsel %vm619_vm4, %v798_v2, 0  ;;  %v921_v6 = vsel %vm619_vm4, %v916_v4, 0 }
 0x2af   : > { %2238 = vmatpush3.bf16.xpose.msra.mxu0 %v803_v3 }
 0x2b0   : > { %2249 = vmatprep.subr.bf16.mxu0 %v2781_v37 }
 0x2b1   : > { %v791_v5 = vpop.permute.xlu1 %790  ;;  %v909_v9 = vpop.permute.xlu0 %908 }
 0x2b2   : > { %2246 = vmatmul.mubr.msk.bf16.vlgmr.msra.gmra.mxu1 %vm619_vm4, %v851_v58 }
 0x2b3   : > { %2257 = vmatprep.mubr.msk.bf16.mxu1 %vm2782_vm2, %v2781_v37 }
 0x2b5   : > { %v976_v7 = vpop.permute.xlu1 %975  ;;  %v969_v12 = vpop.permute.xlu0 %968 }
 0x2b6   : > { %v981_v8 = vsel %vm619_vm4, %v976_v7, 0  ;;  %2240 = vmatmul.mubr.msk.bf16.vlgmr.msra.gmra.mxu0 %vm619_vm4, %v791_v5 }
 0x2b7   : > { %2250 = vmatpush3.bf16.xpose.msra.mxu0 %v921_v6  ;;  %2256 = vmatpush3.bf16.xpose.msra.mxu1 %v981_v8 }
 0x2b8   : > { %2251 = vmatprep.mubr.msk.bf16.mxu0 %vm2782_vm2, %v2781_v37  ;;  %2261 = vmatprep.subr.bf16.mxu0 %v2781_v37 }
 0x2b9   : > { %2267 = vmatprep.subr.bf16.mxu1 %v2781_v37  ;;  %v1036_v10 = vpop.permute.xlu1 %1035  ;;  %v1200_v18 = vpop.permute.xlu0 %1199 }
 0x2ba   : > { %v1041_v11 = vsel %vm619_vm4, %v1036_v10, 0 }
 0x2bd   : > { %v1029_v13 = vpop.permute.xlu1 %1028 }
 0x2be   : > { %2252 = vmatmul.mubr.msk.bf16.vlgmr.msra.gmra.mxu0 %vm619_vm4, %v909_v9  ;;  %2258 = vmatmul.mubr.msk.bf16.vlgmr.msra.gmra.mxu1 %vm619_vm4, %v969_v12 }
 0x2bf   : > { %2262 = vmatpush3.bf16.xpose.msra.mxu0 %v1041_v11  ;;  %2263 = vmatprep.mubr.msk.bf16.mxu0 %vm2782_vm2, %v2781_v37 }
 0x2c0   : > { %2273 = vmatprep.subr.bf16.mxu0 %v2781_v37  ;;  %2268 = vmatpush3.bf16.msra.mxu1 %v2489_v61 }
 0x2c1   : > { %2269 = vmatprep.mubr.msk.bf16.mxu1 %vm2782_vm2, %v2781_v37  ;;  %2279 = vmatprep.subr.bf16.mxu1 %v2781_v37 }
 0x2c6   : > { %2264 = vmatmul.mubr.msk.bf16.vlgmr.msra.gmra.mxu0 %vm619_vm4, %v1029_v13 }
 0x2c7   : > { %2275 = vmatprep.mubr.msk.bf16.mxu0 %vm2782_vm2, %v2781_v37  ;;  %2274 = vmatpush3.bf16.msra.mxu0 %v1200_v18 }
 0x2c8   : > { %2285 = vmatprep.subr.bf16.mxu0 %v2781_v37 }
 0x2f8   : > { %v660_v14 = vpop.f32.mrf.mxu1 }
 0x2f9   : > { %666 = vst.msk [vmem:[#allocation4] sm:$0xff] %vm564_vm3, %v660_v14 }
 0x2fa   : > { %v2223_v15 = vpop.f32.mrf.mxu1 }
 0x2fc   : > { %v663_v16 = vpop.f32.mrf.mxu1 }
 0x2fe   : > { %v2224_v17 = vpop.f32.mrf.mxu1 }
 0x300   : > { %v1086_v51 = vld [vmem:[#allocation4] sm:$0xff] }
 0x36a   : > { %v719_v19 = vpop.f32.mrf.mxu0  ;;  %v779_v20 = vpop.f32.mrf.mxu1 }
 0x36b   : > { %726 = vst.msk [vmem:[#allocation4 + $0x8] sm:$0xff] %vm564_vm3, %v719_v19  ;;  %786 = vst.msk [vmem:[#allocation4 + $0x10] sm:$0xff] %vm564_vm3, %v779_v20  ;;  %v727_v29 = vmax.f32 %v660_v14, %v719_v19 }
 0x36c   : > { %v2229_v21 = vpop.f32.mrf.mxu0  ;;  %v2235_v22 = vpop.f32.mrf.mxu1 }
 0x36d   : > { %v787_v34 = vmax.f32 %v727_v29, %v779_v20 }
 0x36e   : > { %v722_v23 = vpop.f32.mrf.mxu0  ;;  %v782_v24 = vpop.f32.mrf.mxu1 }
 0x370   : > { %v2230_v25 = vpop.f32.mrf.mxu0  ;;  %v2236_v26 = vpop.f32.mrf.mxu1 }
 0x372   : > { %v897_v27 = vpop.f32.mrf.mxu1  ;;  %v1092_v53 = vld [vmem:[#allocation4 + $0x8] sm:$0xff]  ;;  %v1098_v54 = vld [vmem:[#allocation4 + $0x10] sm:$0xff] }
 0x373   : > { %904 = vst.msk [vmem:[#allocation4 + $0x20] sm:$0xff] %vm564_vm3, %v897_v27 }
 0x374   : > { %v2247_v28 = vpop.f32.mrf.mxu1 }
 0x376   : > { %v839_v30 = vpop.f32.mrf.mxu0  ;;  %v900_v31 = vpop.f32.mrf.mxu1 }
 0x377   : > { %846 = vst.msk [vmem:[#allocation4 + $0x18] sm:$0xff] %vm564_vm3, %v839_v30  ;;  %v847_v36 = vmax.f32 %v787_v34, %v839_v30  ;;  %v1135_v30 = vld [vmem:[#allocation16] sm:$0xff]  ;;  %v1136_v31 = vld [vmem:[#allocation16 + $0x8] sm:$0xff] }
 0x378   : > { %v2241_v32 = vpop.f32.mrf.mxu0  ;;  %v2248_v33 = vpop.f32.mrf.mxu1 }
 0x379   : > { %v905_v41 = vmax.f32 %v847_v36, %v897_v27  ;;  %v1139_v32 = vpack.c.bf16 %v1136_v31, %v1135_v30 }
 0x37a   : > { %v842_v35 = vpop.f32.mrf.mxu0  ;;  %v1110_v57 = vld [vmem:[#allocation4 + $0x20] sm:$0xff] }
 0x37b   : > { %v1247_v33 = vrot.slane %v1139_v32, 4 }
 0x37c   : > { %v2242_v38 = vpop.f32.mrf.mxu0 }
 0x37e   : > { %v957_v39 = vpop.f32.mrf.mxu0  ;;  %v1017_v40 = vpop.f32.mrf.mxu1  ;;  %v1104_v55 = vld [vmem:[#allocation4 + $0x18] sm:$0xff] }
 0x37f   : > { %964 = vst.msk [vmem:[#allocation4 + $0x28] sm:$0xff] %vm564_vm3, %v957_v39  ;;  %1024 = vst.msk [vmem:[#allocation4 + $0x30] sm:$0xff] %vm564_vm3, %v1017_v40  ;;  %v965_v44 = vmax.f32 %v905_v41, %v957_v39 }
 0x380   : > { %v2253_v42 = vpop.f32.mrf.mxu0  ;;  %v2259_v43 = vpop.f32.mrf.mxu1 }
 0x381   : > { %v1025_v49 = vmax.f32 %v965_v44, %v1017_v40  ;;  %v1253_v42 = vsel %vm1251_vm5, %v1247_v33, 0  ;;  %v3162_v43 = vsel %vm1251_vm5, %v1139_v32, 0  ;;  %v2490_v44 = vld [vmem:[#allocation3 + $0x8] sm:$0xff]  }
 0x382   : > { %v960_v45 = vpop.f32.mrf.mxu0  ;;  %v1020_v46 = vpop.f32.mrf.mxu1  ;;  %1598 = vrot.lane.b32.xlu1 %v2490_v44, %s2783_s16  ;;  %1734 = vrot.lane.b32.xlu0 %v2490_v44, %s2784_s19 }
 0x384   : > { %v2254_v47 = vpop.f32.mrf.mxu0  ;;  %v2260_v48 = vpop.f32.mrf.mxu1 }
 0x386   : > { %v1077_v50 = vpop.f32.mrf.mxu0  ;;  %v1116_v58 = vld [vmem:[#allocation4 + $0x28] sm:$0xff]  ;;  %v1122_v63 = vld [vmem:[#allocation4 + $0x30] sm:$0xff]  ;;  %1828 = vrot.lane.b32.xlu1 %v2490_v44, %s2785_s10 }
 0x387   : > { %1084 = vst.msk [vmem:[#allocation4 + $0x38] sm:$0xff] %vm564_vm3, %v1077_v50  ;;  %v1085_v52 = vmax.f32 %v1025_v49, %v1077_v50  ;;  %v1345_v49 = vpop.permute.xlu1 %1344 }
 0x388   : > { %v2265_v56 = vpop.f32.mrf.mxu0 }
 0x389   : > { %v1087_v59 = vsub.f32 %v1086_v51, %v1085_v52  ;;  %v1093_v60 = vsub.f32 %v1092_v53, %v1085_v52  ;;  %v1099_v61 = vsub.f32 %v1098_v54, %v1085_v52  ;;  %v1105_v62 = vsub.f32 %v1104_v55, %v1085_v52 }
 0x38a   : > { %v1111_v0 = vsub.f32 %v1110_v57, %v1085_v52  ;;  %v1117_v1 = vsub.f32 %v1116_v58, %v1085_v52  ;;  %v1080_v2 = vpop.f32.mrf.mxu0  ;;  %v1123_v6 = vsub.f32 %v1122_v63, %v1085_v52  ;;  %v1442_v58 = vpop.permute.xlu0 %1441 }
 0x38b   : > { %v1088_v3 = vmul.f32 1.442695, %v1087_v59  ;;  %v1094_v4 = vmul.f32 1.442695, %v1093_v60  ;;  %v1100_v5 = vmul.f32 1.442695, %v1099_v61 }
 0x38c   : > { %v1106_v7 = vmul.f32 1.442695, %v1105_v62  ;;  %v2266_v8 = vpop.f32.mrf.mxu0  ;;  %v1112_v9 = vmul.f32 1.442695, %v1111_v0  ;;  %v1118_v10 = vmul.f32 1.442695, %v1117_v1 }
 0x38d   : > { %2491 = vpow2.f32 %v1088_v3  ;;  %v1124_v12 = vmul.f32 1.442695, %v1123_v6  ;;  %v1137_v2 = vld [vmem:[#allocation16 + $0x10] sm:$0xff]  ;;  %v1138_v3 = vld [vmem:[#allocation16 + $0x18] sm:$0xff] }
 0x38e   : > { %2493 = vpow2.f32 %v1094_v4  ;;  %v1128_v11 = vld [vmem:[#allocation4 + $0x38] sm:$0xff]  ;;  %v1140_v4 = vpack.c.bf16 %v1138_v3, %v1137_v2 }
 0x38f   : > { %2495 = vpow2.f32 %v1100_v5  ;;  %v1129_v13 = vsub.f32 %v1128_v11, %v1085_v52 }
 0x390   : > { %2497 = vpow2.f32 %v1106_v7  ;;  %v1395_v5 = vsel %vm1251_vm5, %v1140_v4, 0 }
 0x391   : > { %2499 = vpow2.f32 %v1112_v9  ;;  %v1130_v14 = vmul.f32 1.442695, %v1129_v13  ;;  %v1489_v13 = vrot.slane %v1140_v4, 4 }
 0x392   : > { %2501 = vpow2.f32 %v1118_v10 }
 0x393   : > { %2503 = vpow2.f32 %v1124_v12 }
 0x394   : > { %2505 = vpow2.f32 %v1130_v14 }
 0x39a   : > { %v2492_v15 = vpop.eup %2491 }
 0x39b   : > { %v2494_v16 = vpop.eup %2493  ;;  %1090 = vst.msk [vmem:[#allocation4] sm:$0xff] %vm564_vm3, %v2492_v15 }
 0x39c   : > { %v2496_v17 = vpop.eup %2495  ;;  %v1097_v18 = vadd.f32 %v2494_v16, %v2492_v15  ;;  %1096 = vst.msk [vmem:[#allocation4 + $0x8] sm:$0xff] %vm564_vm3, %v2494_v16 }
 0x39d   : > { %v2498_v19 = vpop.eup %2497  ;;  %1102 = vst.msk [vmem:[#allocation4 + $0x10] sm:$0xff] %vm564_vm3, %v2496_v17 }
 0x39e   : > { %v2500_v20 = vpop.eup %2499  ;;  %v1103_v21 = vadd.f32 %v2496_v17, %v1097_v18  ;;  %1108 = vst.msk [vmem:[#allocation4 + $0x18] sm:$0xff] %vm564_vm3, %v2498_v19  ;;  %v3194_v18 = vsel %vm1251_vm5, %v1489_v13, 0 }
 0x39f   : > { %v2502_v22 = vpop.eup %2501  ;;  %1114 = vst.msk [vmem:[#allocation4 + $0x20] sm:$0xff] %vm564_vm3, %v2500_v20 }
 0x3a0   : > { %v2504_v23 = vpop.eup %2503  ;;  %v1109_v24 = vadd.f32 %v2498_v19, %v1103_v21  ;;  %1120 = vst.msk [vmem:[#allocation4 + $0x28] sm:$0xff] %vm564_vm3, %v2502_v22 }
 0x3a1   : > { %v2506_v25 = vpop.eup %2505  ;;  %1126 = vst.msk [vmem:[#allocation4 + $0x30] sm:$0xff] %vm564_vm3, %v2504_v23 }
 0x3a2   : > { %v1115_v26 = vadd.f32 %v2500_v20, %v1109_v24  ;;  %1132 = vst.msk [vmem:[#allocation4 + $0x38] sm:$0xff] %vm564_vm3, %v2506_v25  ;;  %v1141_v35 = vld [vmem:[#allocation4] sm:$0xff] }
 0x3a3   : > { %v1196_v36 = vld [vmem:[#allocation4 + $0x8] sm:$0xff] }
 0x3a4   : > { %v1121_v27 = vadd.f32 %v2502_v22, %v1115_v26  ;;  %v1341_v54 = vld [vmem:[#allocation4 + $0x10] sm:$0xff] }
 0x3a5   : > { %v1438_v60 = vld [vmem:[#allocation4 + $0x18] sm:$0xff] }
 0x3a6   : > { %v1127_v28 = vadd.f32 %v2504_v23, %v1121_v27  ;;  %v1539_v63 = vld [vmem:[#allocation4 + $0x20] sm:$0xff] }
 0x3a7   : > { %v1595_v27 = vld [vmem:[#allocation4 + $0x28] sm:$0xff] }
 0x3a8   : > { %v1133_v29 = vadd.f32 %v2506_v25, %v1127_v28 }
 0x3aa   : > { %2507 = vrcp.f32 %v1133_v29 }
 0x3b7   : > { %v3149_v34 = vpop.eup %2507 }
 0x3b8   : > { %v1142_v38 = vmul.f32 %v3149_v34, %v1141_v35  ;;  %v1197_v39 = vmul.f32 %v3149_v34, %v1196_v36  ;;  %v1342_v55 = vmul.f32 %v3149_v34, %v1341_v54  ;;  %v1439_v61 = vmul.f32 %v3149_v34, %v1438_v60 }
 0x3b9   : > { %v1540_v0 = vmul.f32 %v3149_v34, %v1539_v63  ;;  %v1596_v28 = vmul.f32 %v3149_v34, %v1595_v27 }
 0x3ba   : > { %v1143_v40 = vpack.c.bf16 %v1142_v38, %v1142_v38  ;;  %v1198_v41 = vpack.c.bf16 %v1197_v39, %v1197_v39  ;;  %v1343_v59 = vpack.c.bf16 %v1342_v55, %v1342_v55  ;;  %v1440_v62 = vpack.c.bf16 %v1439_v61, %v1439_v61  ;;  %v1825_v61 = vld [vmem:[#allocation4 + $0x38] sm:$0xff] }
 0x3bb   : > { %v1541_v1 = vpack.c.bf16 %v1540_v0, %v1540_v0  ;;  %v1597_v31 = vpack.c.bf16 %v1596_v28, %v1596_v28 }
 0x3bc   : > { %2270 = vmatmul.mubr.msk.bf16.vlgmr.msra.gmra.mxu1 %vm564_vm3, %v1143_v40  ;;  %2276 = vmatmul.mubr.msk.bf16.vlgmr.msra.gmra.mxu0 %vm564_vm3, %v1198_v41 }
 0x3bd   : > { %2280 = vmatpush3.bf16.msra.mxu1 %v1253_v42  ;;  %2281 = vmatprep.mubr.msk.bf16.mxu1 %vm2782_vm2, %v2781_v37 }
 0x3be   : > { %2287 = vmatprep.mubr.msk.bf16.mxu0 %vm2782_vm2, %v2781_v37  ;;  %2291 = vmatprep.subr.bf16.mxu1 %v2781_v37 }
 0x3bf   : > { %2286 = vmatpush3.bf16.msra.mxu0 %v3162_v43 }
 0x3c0   : > { %2297 = vmatprep.subr.bf16.mxu0 %v2781_v37 }
 0x3f4   : > { %v1599_v24 = vpop.permute.xlu1 %1598 }
 0x47c   : > { %v1189_v45 = vpop.f32.mrf.mxu1  ;;  %v1239_v46 = vpop.f32.mrf.mxu0 }
 0x47d   : > { %v1195_v47 = vpack.c.bf16 %v1189_v45, %v1189_v45  ;;  %v1245_v48 = vpack.c.bf16 %v1239_v46, %v1239_v46 }
 0x47e   : > { %v2271_v50 = vpop.f32.mrf.mxu1  ;;  %v2277_v51 = vpop.f32.mrf.mxu0 }
 0x47f   : > { %2282 = vmatmul.mubr.msk.bf16.vlgmr.msra.gmra.mxu1 %vm619_vm4, %v1245_v48  ;;  %2288 = vmatmul.mubr.msk.bf16.vlgmr.msra.gmra.mxu0 %vm619_vm4, %v1195_v47  ;;  %v1735_v50 = vpop.permute.xlu0 %1734 }
 0x480   : > { %v1192_v52 = vpop.f32.mrf.mxu1  ;;  %v1242_v53 = vpop.f32.mrf.mxu0  ;;  %2292 = vmatpush3.bf16.msra.mxu1 %v1345_v49  ;;  %2293 = vmatprep.mubr.msk.bf16.mxu1 %vm2782_vm2, %v2781_v37 }
 0x481   : > { %2303 = vmatprep.subr.bf16.mxu1 %v2781_v37  ;;  %2299 = vmatprep.mubr.msk.bf16.mxu0 %vm2782_vm2, %v2781_v37  ;;  %v1731_v53 = vld [vmem:[#allocation4 + $0x30] sm:$0xff] }
 0x482   : > { %v2272_v56 = vpop.f32.mrf.mxu1  ;;  %v2278_v57 = vpop.f32.mrf.mxu0  ;;  %2298 = vmatpush3.bf16.msra.mxu0 %v1395_v5  ;;  %v1732_v54 = vmul.f32 %v3149_v34, %v1731_v53 }
 0x483   : > { %2309 = vmatprep.subr.bf16.mxu0 %v2781_v37  ;;  %v1829_v57 = vpop.permute.xlu1 %1828 }
 0x487   : > { %2294 = vmatmul.mubr.msk.bf16.vlgmr.msra.gmra.mxu1 %vm564_vm3, %v1343_v59 }
 0x488   : > { %2304 = vmatpush3.bf16.msra.mxu1 %v1442_v58  ;;  %2305 = vmatprep.mubr.msk.bf16.mxu1 %vm2782_vm2, %v2781_v37  ;;  %v1733_v58 = vpack.c.bf16 %v1732_v54, %v1732_v54 }
 0x489   : > { %2315 = vmatprep.subr.bf16.mxu1 %v2781_v37 }
 0x48f   : > { %2306 = vmatmul.mubr.msk.bf16.vlgmr.msra.gmra.mxu1 %vm564_vm3, %v1440_v62  ;;  %v1826_v62 = vmul.f32 %v3149_v34, %v1825_v61 }
 0x490   : > { %2316 = vmatpush3.bf16.msra.mxu1 %v2490_v44  ;;  %2317 = vmatprep.mubr.msk.bf16.mxu1 %vm2782_vm2, %v2781_v37 }
 0x491   : > { %2327 = vmatprep.subr.bf16.mxu1 %v2781_v37  ;;  %v1827_v0 = vpack.c.bf16 %v1826_v62, %v1826_v62 }
 0x497   : > { %2318 = vmatmul.mubr.msk.bf16.vlgmr.msra.gmra.mxu1 %vm564_vm3, %v1541_v1 }
 0x498   : > { %2328 = vmatpush3.bf16.msra.mxu1 %v1253_v42  ;;  %2329 = vmatprep.mubr.msk.bf16.mxu1 %vm2782_vm2, %v2781_v37 }
 0x499   : > { %2339 = vmatprep.subr.bf16.mxu1 %v2781_v37 }
 0x53f   : > { %v1289_v6 = vpop.f32.mrf.mxu1  ;;  %v1335_v7 = vpop.f32.mrf.mxu0 }
 0x540   : > { %v1336_v8 = vadd.f32 %v1335_v7, %v1289_v6 }
 0x541   : > { %v2283_v9 = vpop.f32.mrf.mxu1  ;;  %v2289_v10 = vpop.f32.mrf.mxu0 }
 0x543   : > { %v1292_v11 = vpop.f32.mrf.mxu1  ;;  %v1338_v12 = vpop.f32.mrf.mxu0 }
 0x545   : > { %v2284_v14 = vpop.f32.mrf.mxu1  ;;  %v2290_v15 = vpop.f32.mrf.mxu0 }
 0x547   : > { %v1384_v16 = vpop.f32.mrf.mxu1 }
 0x548   : > { %v1390_v17 = vpack.c.bf16 %v1384_v16, %v1384_v16 }
 0x549   : > { %v2295_v19 = vpop.f32.mrf.mxu1 }
 0x54a   : > { %2300 = vmatmul.mubr.msk.bf16.vlgmr.msra.gmra.mxu0 %vm619_vm4, %v1390_v17 }
 0x54b   : > { %v1387_v20 = vpop.f32.mrf.mxu1  ;;  %2310 = vmatpush3.bf16.msra.mxu0 %v3194_v18  ;;  %2311 = vmatprep.mubr.msk.bf16.mxu0 %vm2782_vm2, %v2781_v37 }
 0x54c   : > { %2321 = vmatprep.subr.bf16.mxu0 %v2781_v37 }
 0x54d   : > { %v2296_v21 = vpop.f32.mrf.mxu1 }
 0x54f   : > { %v1481_v22 = vpop.f32.mrf.mxu1 }
 0x550   : > { %v1487_v23 = vpack.c.bf16 %v1481_v22, %v1481_v22 }
 0x551   : > { %v2307_v25 = vpop.f32.mrf.mxu1 }
 0x552   : > { %2312 = vmatmul.mubr.msk.bf16.vlgmr.msra.gmra.mxu0 %vm619_vm4, %v1487_v23 }
 0x553   : > { %v1484_v26 = vpop.f32.mrf.mxu1  ;;  %2322 = vmatpush3.bf16.msra.mxu0 %v1599_v24  ;;  %2323 = vmatprep.mubr.msk.bf16.mxu0 %vm2782_vm2, %v2781_v37 }
 0x554   : > { %2333 = vmatprep.subr.bf16.mxu0 %v2781_v37 }
 0x555   : > { %v2308_v29 = vpop.f32.mrf.mxu1 }
 0x557   : > { %v1588_v30 = vpop.f32.mrf.mxu1 }
 0x558   : > { %v1594_v36 = vpack.c.bf16 %v1588_v30, %v1588_v30 }
 0x559   : > { %v2319_v32 = vpop.f32.mrf.mxu1 }
 0x55a   : > { %2324 = vmatmul.mubr.msk.bf16.vlgmr.msra.gmra.mxu0 %vm564_vm3, %v1597_v31 }
 0x55b   : > { %v1591_v33 = vpop.f32.mrf.mxu1  ;;  %2334 = vmatpush3.bf16.msra.mxu0 %v3162_v43  ;;  %2335 = vmatprep.mubr.msk.bf16.mxu0 %vm2782_vm2, %v2781_v37 }
 0x55c   : > { %2345 = vmatprep.subr.bf16.mxu0 %v2781_v37 }
 0x55d   : > { %v2320_v35 = vpop.f32.mrf.mxu1 }
 0x562   : > { %2336 = vmatmul.mubr.msk.bf16.vlgmr.msra.gmra.mxu0 %vm619_vm4, %v1594_v36 }
 0x563   : > { %2346 = vmatpush3.bf16.msra.mxu0 %v1395_v5  ;;  %2347 = vmatprep.mubr.msk.bf16.mxu0 %vm2782_vm2, %v2781_v37 }
 0x564   : > { %2357 = vmatprep.subr.bf16.mxu0 %v2781_v37 }
 0x60a   : > { %v1431_v38 = vpop.f32.mrf.mxu0 }
 0x60b   : > { %v1437_v42 = vadd.f32 %v1431_v38, %v1336_v8 }
 0x60c   : > { %v2301_v39 = vpop.f32.mrf.mxu0 }
 0x60e   : > { %v1434_v40 = vpop.f32.mrf.mxu0 }
 0x610   : > { %v2302_v41 = vpop.f32.mrf.mxu0 }
 0x612   : > { %v1530_v43 = vpop.f32.mrf.mxu0 }
 0x613   : > { %v1536_v44 = vadd.f32 %v1530_v43, %v1437_v42 }
 0x614   : > { %v2313_v45 = vpop.f32.mrf.mxu0 }
 0x615   : > { %1538 = vst.msk [vmem:[%s3048_s8] sm:$0xff] %vm1537_vm6, %v1536_v44 }
 0x616   : > { %v1533_v46 = vpop.f32.mrf.mxu0 }
 0x618   : > { %v2314_v47 = vpop.f32.mrf.mxu0 }
 0x61a   : > { %v1638_v48 = vpop.f32.mrf.mxu0 }
 0x61b   : > { %v1644_v49 = vpack.c.bf16 %v1638_v48, %v1638_v48 }
 0x61c   : > { %v2325_v51 = vpop.f32.mrf.mxu0 }
 0x61d   : > { %2330 = vmatmul.mubr.msk.bf16.vlgmr.msra.gmra.mxu1 %vm619_vm4, %v1644_v49 }
 0x61e   : > { %v1641_v52 = vpop.f32.mrf.mxu0  ;;  %2340 = vmatpush3.bf16.msra.mxu1 %v1735_v50  ;;  %2341 = vmatprep.mubr.msk.bf16.mxu1 %vm2782_vm2, %v2781_v37 }
 0x61f   : > { %2351 = vmatprep.subr.bf16.mxu1 %v2781_v37 }
 0x620   : > { %v2326_v55 = vpop.f32.mrf.mxu0 }
 0x622   : > { %v1725_v56 = vpop.f32.mrf.mxu0 }
 0x624   : > { %v2337_v59 = vpop.f32.mrf.mxu0 }
 0x625   : > { %2342 = vmatmul.mubr.msk.bf16.vlgmr.msra.gmra.mxu1 %vm564_vm3, %v1733_v58 }
 0x626   : > { %v1728_v60 = vpop.f32.mrf.mxu0  ;;  %2352 = vmatpush3.bf16.msra.mxu1 %v1829_v57  ;;  %2353 = vmatprep.mubr.msk.bf16.mxu1 %vm2782_vm2, %v2781_v37 }
 0x628   : > { %v2338_v63 = vpop.f32.mrf.mxu0 }
 0x62d   : > { %2354 = vmatmul.mubr.msk.bf16.vlgmr.msra.gmra.mxu1 %vm564_vm3, %v1827_v0 }
 0x6dd   : > { %v1682_v1 = vpop.f32.mrf.mxu1 }
 0x6de   : > { %v1726_v17 = vadd.f32 %v1725_v56, %v1682_v1 }
 0x6df   : > { %v2331_v2 = vpop.f32.mrf.mxu1 }
 0x6e1   : > { %v1685_v3 = vpop.f32.mrf.mxu1 }
 0x6e3   : > { %v2332_v4 = vpop.f32.mrf.mxu1 }
 0x6e5   : > { %v1774_v5 = vpop.f32.mrf.mxu1 }
 0x6e6   : > { %v1780_v6 = vpack.c.bf16 %v1774_v5, %v1774_v5 }
 0x6e7   : > { %v2343_v7 = vpop.f32.mrf.mxu1 }
 0x6e8   : > { %2348 = vmatmul.mubr.msk.bf16.vlgmr.msra.gmra.mxu0 %vm619_vm4, %v1780_v6 }
 0x6e9   : > { %v1777_v8 = vpop.f32.mrf.mxu1  ;;  %2358 = vmatpush3.bf16.msra.mxu0 %v3194_v18  ;;  %2359 = vmatprep.mubr.msk.bf16.mxu0 %vm2782_vm2, %v2781_v37 }
 0x6eb   : > { %v2344_v34 = vpop.f32.mrf.mxu1 }
 0x6ed   : > { %v1868_v9 = vpop.f32.mrf.mxu1 }
 0x6ee   : > { %v1874_v10 = vpack.c.bf16 %v1868_v9, %v1868_v9 }
 0x6ef   : > { %v2355_v11 = vpop.f32.mrf.mxu1 }
 0x6f0   : > { %2360 = vmatmul.mubr.msk.bf16.vlgmr.msra.gmra.mxu0 %vm619_vm4, %v1874_v10 }
 0x6f1   : > { %v1871_v12 = vpop.f32.mrf.mxu1 }
 0x6f3   : > { %v2356_v13 = vpop.f32.mrf.mxu1 }
 0x7a8   : > { %v1818_v14 = vpop.f32.mrf.mxu0 }
 0x7a9   : > { %v1824_v19 = vadd.f32 %v1818_v14, %v1726_v17 }
 0x7aa   : > { %v2349_v15 = vpop.f32.mrf.mxu0 }
 0x7ac   : > { %v1821_v16 = vpop.f32.mrf.mxu0 }
 0x7ae   : > { %v2350_v18 = vpop.f32.mrf.mxu0 }
 0x7b0   : > { %v1912_v37 = vpop.f32.mrf.mxu0 }
 0x7b1   : > { %v1918_v20 = vadd.f32 %v1912_v37, %v1824_v19 }
 0x7b2   : > { %v2361_v21 = vpop.f32.mrf.mxu0 }
 0x7b3   : > { %2132 = vst.msk [vmem:[%s3048_s8 + $0x8] sm:$0xff] %vm1537_vm6, %v1918_v20 }
 0x7b4   : > { %v1915_v22 = vpop.f32.mrf.mxu0 }
 0x7b5   : > { %2706 = shalt.err (!%p2703_p4)
}
 0x7b6   : > { %s2707_s13 = scalar_lea.hbm %s3237_s17, 256  ;;  %s2711_s19 = scalar_lea.hbm %s3291_s7, 512 }
 0x7b7   : > { %p2708_p7 = scmp.ne.s32.totalorder %s3237_s17, %s2707_s13  ;;  %p2712_p8 = scmp.lt.s32.totalorder %s3237_s17, %s3291_s7 }
 0x7b8   : > { %p2713_p10 = scmp.lt.s32.totalorder %s2711_s19, %s2707_s13 }
 0x7b9   : > { %p2709_p2 = pnand %p2708_p7, %p3319_p13 }
 0x7ba   : > { %p2714_p5 = por %p2713_p10, %p2712_p8 }
 0x7bb   : > { %p2710_p9 = pneg %p2709_p2 }
 0x7bd   : > { %p2715_p12 = pnand %p2714_p5, %p2710_p9 }
 0x7bf   : > { %2718 = shalt.err (!%p2715_p12)
}
 0x7c0   : > { %s2787_s20 = smov 128   ;;  %s2788_s28 = smov 256   ;;  %v2362_v23 = vpop.f32.mrf.mxu0 }
 0x7c1   : > { %s2789_s29 = smov 8  }
 0x7c2   : > { %2389 = dma.vmem_to_hbm [thread:$0]  (%p3319_p13), %s3239_s15, 256, %s3237_s17, %s1922_s30, %s2787_s20, %s2788_s28, %s2789_s29  }
 0x7c3 PF: > { %s1949_s23 = sand.u32 1, %s2757_s24   ;;  %p3320_p0 = scmp.ne.s32.totalorder %s3306_s22, 0 }
 0x7c4   : > { %p3321_p6 = scmp.ge.s32.totalorder %s2769_s27, 2  ;;  %s1950_s1 = scalar_lea.sflag [#allocation7], %s1949_s23 }
 0x7c6   : > { %p2415_p11 = pnand %p3321_p6, %p3320_p0 }
 0x7c8   : > { %p2416_p1 = pneg %p2415_p11 }
 0x7ca   : > { %2752 = dma.done.wait (%p2416_p1), %s1950_s1, 256  }
 0x7cb   : > { %2754 = vsyncadd (%p2416_p1), %s1950_s1, 4294967040  ;;  %p23_p3 = scmp.ge.s32.totalorder %s2952_s14, 4   ;;  %s3322_s24 = smov %s2761_s25 }
 0x7cc   : > { %s3323_s25 = smov %s2765_s26  ;;  %s3324_s26 = smov %s2963_s18 }
 0x7cd   : > { %s3325_s27 = smov %s2952_s14  ;;  %25 = sbr.rel (!%p23_p3) target bundleno = 10 (0xa), region = 131 }
 0x7d2   :  { %1955 = vsyncpa [#allocation6], 1 }
 0x7d3   :  { %1957 = vsyncpa [#allocation6 + $0x1], 1 }
 0x7d4   :  { %1958 = vsyncpa [#allocation9], 1 }
 0x7d5   :  { %1959 = vsyncpa [#allocation12], 1 }
 0x7d6   :  { %1960 = vsyncpa [#allocation15], 1 }
 0x7d7   :  { %1961 = vsyncpa [#allocation7], 1 }
 0x7d8   :  { %1963 = vsyncpa [#allocation7 + $0x1], 1 }

</bundles_post_ra>
